<compile_context>
chip_gen: v6e
topology: v6e:2x2x1
jax: 0.10.0
libtpu: 0.0.40
codegen_flags: <defaults>
</compile_context>

<pallas_src>
import functools
import math

import jax
import jax.numpy as jnp
from jax.experimental import pallas as pl
from jax.experimental.pallas import tpu as pltpu


# ----------------------------- shared math ----------------------------------
def _mm(a, b):
    """MXU matmul: bf16 operands, f32 accumulate."""
    return jnp.dot(a.astype(jnp.bfloat16), b.astype(jnp.bfloat16),
                   preferred_element_type=jnp.float32)


def _bmm(spec, a, b):
    """Batched (per-head) MXU matmul: bf16 operands, f32 accumulate."""
    return jnp.einsum(spec, a.astype(jnp.bfloat16), b.astype(jnp.bfloat16),
                      preferred_element_type=jnp.float32)


def _layer_norm(x, w, b, eps=1e-5):
    mean = jnp.mean(x, axis=-1, keepdims=True)
    var = jnp.mean(jnp.square(x - mean), axis=-1, keepdims=True)
    return (x - mean) * jax.lax.rsqrt(var + eps) * w + b


def _encoder_mapper(x, wqkv, wo, w1, w2, vecs, mw, mb, *, n_heads):
    """Post-LN TransformerEncoder (ReLU FFN) + mapper Linear.

    Shared by the Pallas kernel body and the plain-JAX reference so both paths
    trace the identical jaxpr: bf16 matmul operands, f32 accumulation and f32
    elementwise math (LayerNorm / softmax).

    vecs[l] rows: 0 qkv-bias(3E) | 1 out-proj bias(E) | 2 ln1 w | 3 ln1 b
                  4 ffn bias1(F) | 5 ffn bias2(E)     | 6 ln2 w | 7 ln2 b
    """
    x = x.astype(jnp.float32)
    S, E = x.shape
    L, H = wqkv.shape[0], n_heads
    hd = E // H
    F = w1.shape[-1]

    for l in range(L):                    # static unroll; all weights resident
        vl = vecs[l]
        bqkv = vl[0:1, :3 * E]
        bo, ln1w, ln1b = vl[1:2, :E], vl[2:3, :E], vl[3:4, :E]
        b1 = vl[4:5, :F]
        b2, ln2w, ln2b = vl[5:6, :E], vl[6:7, :E], vl[7:8, :E]

        # ---- fused QKV projection: one (S,E)@(E,3E) MXU matmul.
        #      The 1/sqrt(hd) attention scale is folded into the Q columns.
        qkv = _mm(x, wqkv[l]) + bqkv                           # (S, 3E) f32
        q, k, v = qkv[:, :E], qkv[:, E:2 * E], qkv[:, 2 * E:]

        # ---- split heads -> (H, S, hd): lane slices stacked on a major axis
        qh = jnp.stack([q[:, h * hd:(h + 1) * hd] for h in range(H)], axis=0)
        kh = jnp.stack([k[:, h * hd:(h + 1) * hd] for h in range(H)], axis=0)
        vh = jnp.stack([v[:, h * hd:(h + 1) * hd] for h in range(H)], axis=0)

        # ---- scaled dot-product attention (softmax kept in f32, exact)
        s = _bmm('hqd,hkd->hqk', qh, kh)                       # (H, S, S)
        s = s - jnp.max(s, axis=-1, keepdims=True)
        p = jnp.exp(s)
        p = p / jnp.sum(p, axis=-1, keepdims=True)
        ctx = _bmm('hqk,hkd->hqd', p, vh)                      # (H, S, hd)

        # ---- merge heads, fused out-projection: one (S,E)@(E,E) matmul
        ctx = jnp.concatenate([ctx[h] for h in range(H)], axis=-1)   # (S, E)
        attn = _mm(ctx, wo[l]) + bo

        # ---- residual + LayerNorm 1 (post-norm, PyTorch norm_first=False)
        x = _layer_norm(x + attn, ln1w, ln1b)

        # ---- feed forward (ReLU) + residual + LayerNorm 2
        ff = jnp.maximum(_mm(x, w1[l]) + b1, 0.0)
        ff = _mm(ff, w2[l]) + b2
        x = _layer_norm(x + ff, ln2w, ln2b)

    # ---- fused mapper: lane-dense (S, ep_len*E) result
    return _mm(x, mw) + mb


# ------------------------------ Pallas kernel --------------------------------
def mapping_kernel(n_heads, x_ref, wqkv_ref, wo_ref, w1_ref, w2_ref, vecs_ref,
                   mw_ref, mb_ref, o_ref):
    y = _encoder_mapper(x_ref[...], wqkv_ref[...], wo_ref[...], w1_ref[...],
                        w2_ref[...], vecs_ref[...], mw_ref[...], mb_ref[...],
                        n_heads=n_heads)
    o_ref[...] = y.astype(o_ref.dtype)


def mapping_forward(params, img_embedded, ep_len, embed_size, n_heads,
                    train_mode=False):
    S = img_embedded.shape[0]
    P = params["mapper_w"].shape[-1]
    vmem = pl.BlockSpec(memory_space=pltpu.MemorySpace.VMEM)
    out = pl.pallas_call(
        functools.partial(mapping_kernel, n_heads),
        out_shape=jax.ShapeDtypeStruct((S, P), img_embedded.dtype),
        in_specs=[vmem] * 8,
        out_specs=vmem,
        compiler_params=pltpu.CompilerParams(
            # Resident footprint here is < 1 MiB; 16 MiB leaves ample headroom
            # and stays well under the scoped default on all of v5e/v6e/v7x.
            vmem_limit_bytes=16 * 1024 * 1024),
    )(img_embedded, params["wqkv"], params["wo"], params["w1"], params["w2"],
      params["vecs"], params["mapper_w"], params["mapper_b"])
    if train_mode:
        return out.reshape(-1, ep_len, embed_size)
    return out.reshape(ep_len, embed_size)


# -------------------------- deterministic init -------------------------------
# Kernel-friendly host-side layouts:
#   wqkv     : (L, E, 3E) bf16   fused x@W QKV projection (Q cols pre-scaled)
#   wo       : (L, E, E)  bf16   out-projection, x@W layout
#   w1, w2   : (L, E, F), (L, F, E) bf16
#   vecs     : (L, 8, max(3E,F)) f32  packed bias / LayerNorm rows
#   mapper_w : (E, ep_len*E) bf16 ; mapper_b : (1, ep_len*E) f32
def init_params(key, ep_len, num_layers, embed_size, n_heads, forward_expansion):
    E = embed_size
    F = E * forward_expansion
    H = n_heads
    hd = E // H
    P = ep_len * E
    D = max(3 * E, F)
    keys = jax.random.split(key, 4 * num_layers + 1)
    bf16 = jnp.bfloat16

    def kaiming_t(k, fan_in, out_dim):
        # kaiming_normal_(mode='fan_in', relu) on a PyTorch (out, in) Linear
        # weight, returned transposed into x @ W layout (in, out).
        w = jax.random.normal(k, (out_dim, fan_in), jnp.float32)
        return (w * math.sqrt(2.0 / fan_in)).T

    wqkv, wo, w1, w2 = [], [], [], []
    for l in range(num_layers):
        k0, k1, k2, k3 = keys[4 * l: 4 * l + 4]
        # MHA in_proj in x@W layout; fold the 1/sqrt(hd) scale into Q columns.
        w_in = jax.random.normal(k0, (E, 3 * E), jnp.float32) * math.sqrt(1.0 / E)
        w_in = w_in.at[:, :E].multiply(1.0 / math.sqrt(hd))
        wqkv.append(w_in)
        wo.append(kaiming_t(k1, E, E))      # out_proj
        w1.append(kaiming_t(k2, E, F))      # linear1
        w2.append(kaiming_t(k3, F, E))      # linear2

    # Packed per-layer vector slab (all biases zero, LayerNorm weights one).
    vecs = jnp.zeros((num_layers, 8, D), jnp.float32)
    vecs = vecs.at[:, 2, :E].set(1.0)       # ln1 weight
    vecs = vecs.at[:, 6, :E].set(1.0)       # ln2 weight

    return dict(
        wqkv=jnp.stack(wqkv).astype(bf16),
        wo=jnp.stack(wo).astype(bf16),
        w1=jnp.stack(w1).astype(bf16),
        w2=jnp.stack(w2).astype(bf16),
        vecs=vecs,
        mapper_w=kaiming_t(keys[-1], E, P).astype(bf16),
        mapper_b=jnp.zeros((1, P), jnp.float32),
    )


# ----------------------------- plain-JAX reference ---------------------------
def reference_forward(params, x, ep_len, embed_size, n_heads, train_mode=False):
    out = _encoder_mapper(x, params["wqkv"], params["wo"], params["w1"],
                          params["w2"], params["vecs"], params["mapper_w"],
                          params["mapper_b"], n_heads=n_heads)
    if train_mode:
        return out.reshape(-1, ep_len, embed_size)
    return out.reshape(ep_len, embed_size)


# ---------------------------------- main -------------------------------------
if __name__ == "__main__":
    ep_len, num_layers, embed_size, n_heads, forward_expansion = 4, 2, 32, 4, 4
    # dropout is inference-mode (eval), so it is a no-op here.

    key = jax.random.PRNGKey(0)
    pkey, xkey, tkey = jax.random.split(key, 3)
    params = init_params(pkey, ep_len, num_layers, embed_size, n_heads,
                         forward_expansion)

    # inference (train_mode=False): one image embedding as a length-1 sequence
    img_embedded = jax.random.normal(xkey, (1, embed_size), jnp.float32)
    out = mapping_forward(params, img_embedded, ep_len, embed_size, n_heads,
                          train_mode=False)
    out = jax.block_until_ready(out)
    ref = reference_forward(params, img_embedded, ep_len, embed_size, n_heads,
                            train_mode=False)
    assert out.shape == (ep_len, embed_size), out.shape
    assert jnp.allclose(out, ref, atol=2e-3, rtol=2e-3), "inference mismatch"

    # train_mode=True: PyTorch treats the 2-D (N, E) input as an unbatched
    # length-N sequence; only the output view differs from eval mode.
    x_train = jax.random.normal(tkey, (3, embed_size), jnp.float32)
    out_t = mapping_forward(params, x_train, ep_len, embed_size, n_heads,
                            train_mode=True)
    out_t = jax.block_until_ready(out_t)
    ref_t = reference_forward(params, x_train, ep_len, embed_size, n_heads,
                              train_mode=True)
    assert out_t.shape == (3, ep_len, embed_size), out_t.shape
    assert jnp.allclose(out_t, ref_t, atol=2e-3, rtol=2e-3), "train-mode mismatch"

    print("KERNEL_OK")
</pallas_src>

<mosaic_0001>
module attributes {stable_mosaic.version = 11 : i64} {
  func.func @mapping_kernel(%arg0: memref<1x32xf32, #tpu.memory_space<vmem>>, %arg1: memref<2x32x96xbf16, #tpu.memory_space<vmem>>, %arg2: memref<2x32x32xbf16, #tpu.memory_space<vmem>>, %arg3: memref<2x32x128xbf16, #tpu.memory_space<vmem>>, %arg4: memref<2x128x32xbf16, #tpu.memory_space<vmem>>, %arg5: memref<2x8x128xf32, #tpu.memory_space<vmem>>, %arg6: memref<32x128xbf16, #tpu.memory_space<vmem>>, %arg7: memref<1x128xf32, #tpu.memory_space<vmem>>, %arg8: memref<1x128xf32, #tpu.memory_space<vmem>>) attributes {dimension_semantics = [], scalar_prefetch = 0 : i64, scratch_operands = 0 : i64, tpu.core_type = #tpu.core_type<tc>} {
    %c0 = arith.constant 0 : index
    %c0_0 = arith.constant 0 : index
    %0 = vector.load %arg0[%c0, %c0_0] : memref<1x32xf32, #tpu.memory_space<vmem>>, vector<1x32xf32>
    %c0_1 = arith.constant 0 : index
    %c0_2 = arith.constant 0 : index
    %c0_3 = arith.constant 0 : index
    %1 = vector.load %arg1[%c0_1, %c0_2, %c0_3] : memref<2x32x96xbf16, #tpu.memory_space<vmem>>, vector<2x32x96xbf16>
    %c0_4 = arith.constant 0 : index
    %c0_5 = arith.constant 0 : index
    %c0_6 = arith.constant 0 : index
    %2 = vector.load %arg2[%c0_4, %c0_5, %c0_6] : memref<2x32x32xbf16, #tpu.memory_space<vmem>>, vector<2x32x32xbf16>
    %c0_7 = arith.constant 0 : index
    %c0_8 = arith.constant 0 : index
    %c0_9 = arith.constant 0 : index
    %3 = vector.load %arg3[%c0_7, %c0_8, %c0_9] : memref<2x32x128xbf16, #tpu.memory_space<vmem>>, vector<2x32x128xbf16>
    %c0_10 = arith.constant 0 : index
    %c0_11 = arith.constant 0 : index
    %c0_12 = arith.constant 0 : index
    %4 = vector.load %arg4[%c0_10, %c0_11, %c0_12] : memref<2x128x32xbf16, #tpu.memory_space<vmem>>, vector<2x128x32xbf16>
    %c0_13 = arith.constant 0 : index
    %c0_14 = arith.constant 0 : index
    %c0_15 = arith.constant 0 : index
    %5 = vector.load %arg5[%c0_13, %c0_14, %c0_15] : memref<2x8x128xf32, #tpu.memory_space<vmem>>, vector<2x8x128xf32>
    %c0_16 = arith.constant 0 : index
    %c0_17 = arith.constant 0 : index
    %6 = vector.load %arg6[%c0_16, %c0_17] : memref<32x128xbf16, #tpu.memory_space<vmem>>, vector<32x128xbf16>
    %c0_18 = arith.constant 0 : index
    %c0_19 = arith.constant 0 : index
    %7 = vector.load %arg7[%c0_18, %c0_19] : memref<1x128xf32, #tpu.memory_space<vmem>>, vector<1x128xf32>
    %8 = vector.extract_strided_slice %5 {offsets = [0, 0, 0], sizes = [1, 8, 128], strides = [1, 1, 1]} : vector<2x8x128xf32> to vector<1x8x128xf32>
    %9 = vector.shape_cast %8 : vector<1x8x128xf32> to vector<8x128xf32>
    %10 = vector.extract_strided_slice %9 {offsets = [0, 0], sizes = [1, 96], strides = [1, 1]} : vector<8x128xf32> to vector<1x96xf32>
    %11 = vector.extract_strided_slice %9 {offsets = [1, 0], sizes = [1, 32], strides = [1, 1]} : vector<8x128xf32> to vector<1x32xf32>
    %12 = vector.extract_strided_slice %9 {offsets = [2, 0], sizes = [1, 32], strides = [1, 1]} : vector<8x128xf32> to vector<1x32xf32>
    %13 = vector.extract_strided_slice %9 {offsets = [3, 0], sizes = [1, 32], strides = [1, 1]} : vector<8x128xf32> to vector<1x32xf32>
    %14 = vector.extract_strided_slice %9 {offsets = [4, 0], sizes = [1, 128], strides = [1, 1]} : vector<8x128xf32> to vector<1x128xf32>
    %15 = vector.extract_strided_slice %9 {offsets = [5, 0], sizes = [1, 32], strides = [1, 1]} : vector<8x128xf32> to vector<1x32xf32>
    %16 = vector.extract_strided_slice %9 {offsets = [6, 0], sizes = [1, 32], strides = [1, 1]} : vector<8x128xf32> to vector<1x32xf32>
    %17 = vector.extract_strided_slice %9 {offsets = [7, 0], sizes = [1, 32], strides = [1, 1]} : vector<8x128xf32> to vector<1x32xf32>
    %18 = vector.extract_strided_slice %1 {offsets = [0, 0, 0], sizes = [1, 32, 96], strides = [1, 1, 1]} : vector<2x32x96xbf16> to vector<1x32x96xbf16>
    %19 = vector.shape_cast %18 : vector<1x32x96xbf16> to vector<32x96xbf16>
    %20 = arith.truncf %0 : vector<1x32xf32> to vector<1x32xbf16>
    %cst = arith.constant dense<0.000000e+00> : vector<1x96xf32>
    %21 = tpu.matmul %20, %19, %cst {dimension_numbers = #tpu.dot_dimension_numbers<[1], [0], [0], [1], [0, 0, 1, 1], [], []>} : vector<1x32xbf16>, vector<32x96xbf16>, vector<1x96xf32> -> vector<1x96xf32>
    %22 = arith.addf %21, %10 : vector<1x96xf32>
    %23 = vector.extract_strided_slice %22 {offsets = [0, 0], sizes = [1, 32], strides = [1, 1]} : vector<1x96xf32> to vector<1x32xf32>
    %24 = vector.extract_strided_slice %22 {offsets = [0, 32], sizes = [1, 32], strides = [1, 1]} : vector<1x96xf32> to vector<1x32xf32>
    %25 = vector.extract_strided_slice %22 {offsets = [0, 64], sizes = [1, 32], strides = [1, 1]} : vector<1x96xf32> to vector<1x32xf32>
    %26 = vector.extract_strided_slice %23 {offsets = [0, 0], sizes = [1, 8], strides = [1, 1]} : vector<1x32xf32> to vector<1x8xf32>
    %27 = vector.extract_strided_slice %23 {offsets = [0, 8], sizes = [1, 8], strides = [1, 1]} : vector<1x32xf32> to vector<1x8xf32>
    %28 = vector.extract_strided_slice %23 {offsets = [0, 16], sizes = [1, 8], strides = [1, 1]} : vector<1x32xf32> to vector<1x8xf32>
    %29 = vector.extract_strided_slice %23 {offsets = [0, 24], sizes = [1, 8], strides = [1, 1]} : vector<1x32xf32> to vector<1x8xf32>
    %30 = vector.shape_cast %26 : vector<1x8xf32> to vector<1x1x8xf32>
    %31 = vector.shape_cast %27 : vector<1x8xf32> to vector<1x1x8xf32>
    %32 = vector.shape_cast %28 : vector<1x8xf32> to vector<1x1x8xf32>
    %33 = vector.shape_cast %29 : vector<1x8xf32> to vector<1x1x8xf32>
    %34 = tpu.concatenate %30, %31, %32, %33 in 0 : vector<1x1x8xf32>, vector<1x1x8xf32>, vector<1x1x8xf32>, vector<1x1x8xf32> -> vector<4x1x8xf32>
    %35 = vector.extract_strided_slice %24 {offsets = [0, 0], sizes = [1, 8], strides = [1, 1]} : vector<1x32xf32> to vector<1x8xf32>
    %36 = vector.extract_strided_slice %24 {offsets = [0, 8], sizes = [1, 8], strides = [1, 1]} : vector<1x32xf32> to vector<1x8xf32>
    %37 = vector.extract_strided_slice %24 {offsets = [0, 16], sizes = [1, 8], strides = [1, 1]} : vector<1x32xf32> to vector<1x8xf32>
    %38 = vector.extract_strided_slice %24 {offsets = [0, 24], sizes = [1, 8], strides = [1, 1]} : vector<1x32xf32> to vector<1x8xf32>
    %39 = vector.shape_cast %35 : vector<1x8xf32> to vector<1x1x8xf32>
    %40 = vector.shape_cast %36 : vector<1x8xf32> to vector<1x1x8xf32>
    %41 = vector.shape_cast %37 : vector<1x8xf32> to vector<1x1x8xf32>
    %42 = vector.shape_cast %38 : vector<1x8xf32> to vector<1x1x8xf32>
    %43 = tpu.concatenate %39, %40, %41, %42 in 0 : vector<1x1x8xf32>, vector<1x1x8xf32>, vector<1x1x8xf32>, vector<1x1x8xf32> -> vector<4x1x8xf32>
    %44 = vector.extract_strided_slice %25 {offsets = [0, 0], sizes = [1, 8], strides = [1, 1]} : vector<1x32xf32> to vector<1x8xf32>
    %45 = vector.extract_strided_slice %25 {offsets = [0, 8], sizes = [1, 8], strides = [1, 1]} : vector<1x32xf32> to vector<1x8xf32>
    %46 = vector.extract_strided_slice %25 {offsets = [0, 16], sizes = [1, 8], strides = [1, 1]} : vector<1x32xf32> to vector<1x8xf32>
    %47 = vector.extract_strided_slice %25 {offsets = [0, 24], sizes = [1, 8], strides = [1, 1]} : vector<1x32xf32> to vector<1x8xf32>
    %48 = vector.shape_cast %44 : vector<1x8xf32> to vector<1x1x8xf32>
    %49 = vector.shape_cast %45 : vector<1x8xf32> to vector<1x1x8xf32>
    %50 = vector.shape_cast %46 : vector<1x8xf32> to vector<1x1x8xf32>
    %51 = vector.shape_cast %47 : vector<1x8xf32> to vector<1x1x8xf32>
    %52 = tpu.concatenate %48, %49, %50, %51 in 0 : vector<1x1x8xf32>, vector<1x1x8xf32>, vector<1x1x8xf32>, vector<1x1x8xf32> -> vector<4x1x8xf32>
    %53 = arith.truncf %34 : vector<4x1x8xf32> to vector<4x1x8xbf16>
    %54 = arith.truncf %43 : vector<4x1x8xf32> to vector<4x1x8xbf16>
    "tpu.trace_start"() <{level = 10 : i32, message = "hqd,hkd->hqk"}> : () -> ()
    %cst_20 = arith.constant dense<0.000000e+00> : vector<4x1x1xf32>
    %55 = tpu.matmul %53, %54, %cst_20 {dimension_numbers = #tpu.dot_dimension_numbers<[2], [2], [1], [1], [0, 0, 0, 1, 1, 1], [0], [0]>} : vector<4x1x8xbf16>, vector<4x1x8xbf16>, vector<4x1x1xf32> -> vector<4x1x1xf32>
    "tpu.trace_stop"() : () -> ()
    %cst_21 = arith.constant dense<0xFF800000> : vector<4x1xf32>
    %56 = vector.multi_reduction <maximumf>, %55, %cst_21 [2] : vector<4x1x1xf32> to vector<4x1xf32>
    %57 = vector.shape_cast %56 : vector<4x1xf32> to vector<4x1x1xf32>
    %58 = arith.subf %55, %57 : vector<4x1x1xf32>
    %59 = math.exp %58 : vector<4x1x1xf32>
    %cst_22 = arith.constant dense<0.000000e+00> : vector<4x1xf32>
    %60 = vector.multi_reduction <add>, %59, %cst_22 [2] : vector<4x1x1xf32> to vector<4x1xf32>
    %61 = vector.shape_cast %60 : vector<4x1xf32> to vector<4x1x1xf32>
    %62 = arith.divf %59, %61 : vector<4x1x1xf32>
    %63 = arith.truncf %62 : vector<4x1x1xf32> to vector<4x1x1xbf16>
    %64 = arith.truncf %52 : vector<4x1x8xf32> to vector<4x1x8xbf16>
    "tpu.trace_start"() <{level = 10 : i32, message = "hqk,hkd->hqd"}> : () -> ()
    %cst_23 = arith.constant dense<0.000000e+00> : vector<4x1x8xf32>
    %65 = tpu.matmul %63, %64, %cst_23 {dimension_numbers = #tpu.dot_dimension_numbers<[2], [1], [1], [2], [0, 0, 0, 1, 1, 2], [0], [0]>} : vector<4x1x1xbf16>, vector<4x1x8xbf16>, vector<4x1x8xf32> -> vector<4x1x8xf32>
    "tpu.trace_stop"() : () -> ()
    %66 = vector.extract_strided_slice %65 {offsets = [0, 0, 0], sizes = [1, 1, 8], strides = [1, 1, 1]} : vector<4x1x8xf32> to vector<1x1x8xf32>
    %67 = vector.shape_cast %66 : vector<1x1x8xf32> to vector<1x8xf32>
    %68 = vector.extract_strided_slice %65 {offsets = [1, 0, 0], sizes = [1, 1, 8], strides = [1, 1, 1]} : vector<4x1x8xf32> to vector<1x1x8xf32>
    %69 = vector.shape_cast %68 : vector<1x1x8xf32> to vector<1x8xf32>
    %70 = vector.extract_strided_slice %65 {offsets = [2, 0, 0], sizes = [1, 1, 8], strides = [1, 1, 1]} : vector<4x1x8xf32> to vector<1x1x8xf32>
    %71 = vector.shape_cast %70 : vector<1x1x8xf32> to vector<1x8xf32>
    %72 = vector.extract_strided_slice %65 {offsets = [3, 0, 0], sizes = [1, 1, 8], strides = [1, 1, 1]} : vector<4x1x8xf32> to vector<1x1x8xf32>
    %73 = vector.shape_cast %72 : vector<1x1x8xf32> to vector<1x8xf32>
    %74 = tpu.concatenate %67, %69, %71, %73 in 1 : vector<1x8xf32>, vector<1x8xf32>, vector<1x8xf32>, vector<1x8xf32> -> vector<1x32xf32>
    %75 = vector.extract_strided_slice %2 {offsets = [0, 0, 0], sizes = [1, 32, 32], strides = [1, 1, 1]} : vector<2x32x32xbf16> to vector<1x32x32xbf16>
    %76 = vector.shape_cast %75 : vector<1x32x32xbf16> to vector<32x32xbf16>
    %77 = arith.truncf %74 : vector<1x32xf32> to vector<1x32xbf16>
    %cst_24 = arith.constant dense<0.000000e+00> : vector<1x32xf32>
    %78 = tpu.matmul %77, %76, %cst_24 {dimension_numbers = #tpu.dot_dimension_numbers<[1], [0], [0], [1], [0, 0, 1, 1], [], []>} : vector<1x32xbf16>, vector<32x32xbf16>, vector<1x32xf32> -> vector<1x32xf32>
    %79 = arith.addf %78, %11 : vector<1x32xf32>
    %80 = arith.addf %0, %79 : vector<1x32xf32>
    %cst_25 = arith.constant dense<0.000000e+00> : vector<1xf32>
    %81 = vector.multi_reduction <add>, %80, %cst_25 [1] : vector<1x32xf32> to vector<1xf32>
    %82 = vector.shape_cast %81 : vector<1xf32> to vector<1x1xf32>
    %cst_26 = arith.constant 3.200000e+01 : f32
    %83 = vector.broadcast %cst_26 : f32 to vector<1x1xf32>
    %84 = arith.divf %82, %83 : vector<1x1xf32>
    %85 = vector.broadcast %84 : vector<1x1xf32> to vector<1x32xf32>
    %86 = arith.subf %80, %85 : vector<1x32xf32>
    %87 = arith.mulf %86, %86 : vector<1x32xf32>
    %cst_27 = arith.constant dense<0.000000e+00> : vector<1xf32>
    %88 = vector.multi_reduction <add>, %87, %cst_27 [1] : vector<1x32xf32> to vector<1xf32>
    %89 = vector.shape_cast %88 : vector<1xf32> to vector<1x1xf32>
    %cst_28 = arith.constant 3.200000e+01 : f32
    %90 = vector.broadcast %cst_28 : f32 to vector<1x1xf32>
    %91 = arith.divf %89, %90 : vector<1x1xf32>
    %92 = vector.broadcast %84 : vector<1x1xf32> to vector<1x32xf32>
    %93 = arith.subf %80, %92 : vector<1x32xf32>
    %cst_29 = arith.constant 9.99999974E-6 : f32
    %94 = vector.broadcast %cst_29 : f32 to vector<1x1xf32>
    %95 = arith.addf %91, %94 : vector<1x1xf32>
    %96 = math.rsqrt %95 : vector<1x1xf32>
    %97 = vector.broadcast %96 : vector<1x1xf32> to vector<1x32xf32>
    %98 = arith.mulf %93, %97 : vector<1x32xf32>
    %99 = arith.mulf %98, %12 : vector<1x32xf32>
    %100 = arith.addf %99, %13 : vector<1x32xf32>
    %101 = vector.extract_strided_slice %3 {offsets = [0, 0, 0], sizes = [1, 32, 128], strides = [1, 1, 1]} : vector<2x32x128xbf16> to vector<1x32x128xbf16>
    %102 = vector.shape_cast %101 : vector<1x32x128xbf16> to vector<32x128xbf16>
    %103 = arith.truncf %100 : vector<1x32xf32> to vector<1x32xbf16>
    %cst_30 = arith.constant dense<0.000000e+00> : vector<1x128xf32>
    %104 = tpu.matmul %103, %102, %cst_30 {dimension_numbers = #tpu.dot_dimension_numbers<[1], [0], [0], [1], [0, 0, 1, 1], [], []>} : vector<1x32xbf16>, vector<32x128xbf16>, vector<1x128xf32> -> vector<1x128xf32>
    %105 = arith.addf %104, %14 : vector<1x128xf32>
    %cst_31 = arith.constant 0.000000e+00 : f32
    %106 = vector.broadcast %cst_31 : f32 to vector<1x128xf32>
    %107 = arith.maximumf %105, %106 : vector<1x128xf32>
    %108 = vector.extract_strided_slice %4 {offsets = [0, 0, 0], sizes = [1, 128, 32], strides = [1, 1, 1]} : vector<2x128x32xbf16> to vector<1x128x32xbf16>
    %109 = vector.shape_cast %108 : vector<1x128x32xbf16> to vector<128x32xbf16>
    %110 = arith.truncf %107 : vector<1x128xf32> to vector<1x128xbf16>
    %cst_32 = arith.constant dense<0.000000e+00> : vector<1x32xf32>
    %111 = tpu.matmul %110, %109, %cst_32 {dimension_numbers = #tpu.dot_dimension_numbers<[1], [0], [0], [1], [0, 0, 1, 1], [], []>} : vector<1x128xbf16>, vector<128x32xbf16>, vector<1x32xf32> -> vector<1x32xf32>
    %112 = arith.addf %111, %15 : vector<1x32xf32>
    %113 = arith.addf %100, %112 : vector<1x32xf32>
    %cst_33 = arith.constant dense<0.000000e+00> : vector<1xf32>
    %114 = vector.multi_reduction <add>, %113, %cst_33 [1] : vector<1x32xf32> to vector<1xf32>
    %115 = vector.shape_cast %114 : vector<1xf32> to vector<1x1xf32>
    %cst_34 = arith.constant 3.200000e+01 : f32
    %116 = vector.broadcast %cst_34 : f32 to vector<1x1xf32>
    %117 = arith.divf %115, %116 : vector<1x1xf32>
    %118 = vector.broadcast %117 : vector<1x1xf32> to vector<1x32xf32>
    %119 = arith.subf %113, %118 : vector<1x32xf32>
    %120 = arith.mulf %119, %119 : vector<1x32xf32>
    %cst_35 = arith.constant dense<0.000000e+00> : vector<1xf32>
    %121 = vector.multi_reduction <add>, %120, %cst_35 [1] : vector<1x32xf32> to vector<1xf32>
    %122 = vector.shape_cast %121 : vector<1xf32> to vector<1x1xf32>
    %cst_36 = arith.constant 3.200000e+01 : f32
    %123 = vector.broadcast %cst_36 : f32 to vector<1x1xf32>
    %124 = arith.divf %122, %123 : vector<1x1xf32>
    %125 = vector.broadcast %117 : vector<1x1xf32> to vector<1x32xf32>
    %126 = arith.subf %113, %125 : vector<1x32xf32>
    %cst_37 = arith.constant 9.99999974E-6 : f32
    %127 = vector.broadcast %cst_37 : f32 to vector<1x1xf32>
    %128 = arith.addf %124, %127 : vector<1x1xf32>
    %129 = math.rsqrt %128 : vector<1x1xf32>
    %130 = vector.broadcast %129 : vector<1x1xf32> to vector<1x32xf32>
    %131 = arith.mulf %126, %130 : vector<1x32xf32>
    %132 = arith.mulf %131, %16 : vector<1x32xf32>
    %133 = arith.addf %132, %17 : vector<1x32xf32>
    %134 = vector.extract_strided_slice %5 {offsets = [1, 0, 0], sizes = [1, 8, 128], strides = [1, 1, 1]} : vector<2x8x128xf32> to vector<1x8x128xf32>
    %135 = vector.shape_cast %134 : vector<1x8x128xf32> to vector<8x128xf32>
    %136 = vector.extract_strided_slice %135 {offsets = [0, 0], sizes = [1, 96], strides = [1, 1]} : vector<8x128xf32> to vector<1x96xf32>
    %137 = vector.extract_strided_slice %135 {offsets = [1, 0], sizes = [1, 32], strides = [1, 1]} : vector<8x128xf32> to vector<1x32xf32>
    %138 = vector.extract_strided_slice %135 {offsets = [2, 0], sizes = [1, 32], strides = [1, 1]} : vector<8x128xf32> to vector<1x32xf32>
    %139 = vector.extract_strided_slice %135 {offsets = [3, 0], sizes = [1, 32], strides = [1, 1]} : vector<8x128xf32> to vector<1x32xf32>
    %140 = vector.extract_strided_slice %135 {offsets = [4, 0], sizes = [1, 128], strides = [1, 1]} : vector<8x128xf32> to vector<1x128xf32>
    %141 = vector.extract_strided_slice %135 {offsets = [5, 0], sizes = [1, 32], strides = [1, 1]} : vector<8x128xf32> to vector<1x32xf32>
    %142 = vector.extract_strided_slice %135 {offsets = [6, 0], sizes = [1, 32], strides = [1, 1]} : vector<8x128xf32> to vector<1x32xf32>
    %143 = vector.extract_strided_slice %135 {offsets = [7, 0], sizes = [1, 32], strides = [1, 1]} : vector<8x128xf32> to vector<1x32xf32>
    %144 = vector.extract_strided_slice %1 {offsets = [1, 0, 0], sizes = [1, 32, 96], strides = [1, 1, 1]} : vector<2x32x96xbf16> to vector<1x32x96xbf16>
    %145 = vector.shape_cast %144 : vector<1x32x96xbf16> to vector<32x96xbf16>
    %146 = arith.truncf %133 : vector<1x32xf32> to vector<1x32xbf16>
    %cst_38 = arith.constant dense<0.000000e+00> : vector<1x96xf32>
    %147 = tpu.matmul %146, %145, %cst_38 {dimension_numbers = #tpu.dot_dimension_numbers<[1], [0], [0], [1], [0, 0, 1, 1], [], []>} : vector<1x32xbf16>, vector<32x96xbf16>, vector<1x96xf32> -> vector<1x96xf32>
    %148 = arith.addf %147, %136 : vector<1x96xf32>
    %149 = vector.extract_strided_slice %148 {offsets = [0, 0], sizes = [1, 32], strides = [1, 1]} : vector<1x96xf32> to vector<1x32xf32>
    %150 = vector.extract_strided_slice %148 {offsets = [0, 32], sizes = [1, 32], strides = [1, 1]} : vector<1x96xf32> to vector<1x32xf32>
    %151 = vector.extract_strided_slice %148 {offsets = [0, 64], sizes = [1, 32], strides = [1, 1]} : vector<1x96xf32> to vector<1x32xf32>
    %152 = vector.extract_strided_slice %149 {offsets = [0, 0], sizes = [1, 8], strides = [1, 1]} : vector<1x32xf32> to vector<1x8xf32>
    %153 = vector.extract_strided_slice %149 {offsets = [0, 8], sizes = [1, 8], strides = [1, 1]} : vector<1x32xf32> to vector<1x8xf32>
    %154 = vector.extract_strided_slice %149 {offsets = [0, 16], sizes = [1, 8], strides = [1, 1]} : vector<1x32xf32> to vector<1x8xf32>
    %155 = vector.extract_strided_slice %149 {offsets = [0, 24], sizes = [1, 8], strides = [1, 1]} : vector<1x32xf32> to vector<1x8xf32>
    %156 = vector.shape_cast %152 : vector<1x8xf32> to vector<1x1x8xf32>
    %157 = vector.shape_cast %153 : vector<1x8xf32> to vector<1x1x8xf32>
    %158 = vector.shape_cast %154 : vector<1x8xf32> to vector<1x1x8xf32>
    %159 = vector.shape_cast %155 : vector<1x8xf32> to vector<1x1x8xf32>
    %160 = tpu.concatenate %156, %157, %158, %159 in 0 : vector<1x1x8xf32>, vector<1x1x8xf32>, vector<1x1x8xf32>, vector<1x1x8xf32> -> vector<4x1x8xf32>
    %161 = vector.extract_strided_slice %150 {offsets = [0, 0], sizes = [1, 8], strides = [1, 1]} : vector<1x32xf32> to vector<1x8xf32>
    %162 = vector.extract_strided_slice %150 {offsets = [0, 8], sizes = [1, 8], strides = [1, 1]} : vector<1x32xf32> to vector<1x8xf32>
    %163 = vector.extract_strided_slice %150 {offsets = [0, 16], sizes = [1, 8], strides = [1, 1]} : vector<1x32xf32> to vector<1x8xf32>
    %164 = vector.extract_strided_slice %150 {offsets = [0, 24], sizes = [1, 8], strides = [1, 1]} : vector<1x32xf32> to vector<1x8xf32>
    %165 = vector.shape_cast %161 : vector<1x8xf32> to vector<1x1x8xf32>
    %166 = vector.shape_cast %162 : vector<1x8xf32> to vector<1x1x8xf32>
    %167 = vector.shape_cast %163 : vector<1x8xf32> to vector<1x1x8xf32>
    %168 = vector.shape_cast %164 : vector<1x8xf32> to vector<1x1x8xf32>
    %169 = tpu.concatenate %165, %166, %167, %168 in 0 : vector<1x1x8xf32>, vector<1x1x8xf32>, vector<1x1x8xf32>, vector<1x1x8xf32> -> vector<4x1x8xf32>
    %170 = vector.extract_strided_slice %151 {offsets = [0, 0], sizes = [1, 8], strides = [1, 1]} : vector<1x32xf32> to vector<1x8xf32>
    %171 = vector.extract_strided_slice %151 {offsets = [0, 8], sizes = [1, 8], strides = [1, 1]} : vector<1x32xf32> to vector<1x8xf32>
    %172 = vector.extract_strided_slice %151 {offsets = [0, 16], sizes = [1, 8], strides = [1, 1]} : vector<1x32xf32> to vector<1x8xf32>
    %173 = vector.extract_strided_slice %151 {offsets = [0, 24], sizes = [1, 8], strides = [1, 1]} : vector<1x32xf32> to vector<1x8xf32>
    %174 = vector.shape_cast %170 : vector<1x8xf32> to vector<1x1x8xf32>
    %175 = vector.shape_cast %171 : vector<1x8xf32> to vector<1x1x8xf32>
    %176 = vector.shape_cast %172 : vector<1x8xf32> to vector<1x1x8xf32>
    %177 = vector.shape_cast %173 : vector<1x8xf32> to vector<1x1x8xf32>
    %178 = tpu.concatenate %174, %175, %176, %177 in 0 : vector<1x1x8xf32>, vector<1x1x8xf32>, vector<1x1x8xf32>, vector<1x1x8xf32> -> vector<4x1x8xf32>
    %179 = arith.truncf %160 : vector<4x1x8xf32> to vector<4x1x8xbf16>
    %180 = arith.truncf %169 : vector<4x1x8xf32> to vector<4x1x8xbf16>
    "tpu.trace_start"() <{level = 10 : i32, message = "hqd,hkd->hqk"}> : () -> ()
    %cst_39 = arith.constant dense<0.000000e+00> : vector<4x1x1xf32>
    %181 = tpu.matmul %179, %180, %cst_39 {dimension_numbers = #tpu.dot_dimension_numbers<[2], [2], [1], [1], [0, 0, 0, 1, 1, 1], [0], [0]>} : vector<4x1x8xbf16>, vector<4x1x8xbf16>, vector<4x1x1xf32> -> vector<4x1x1xf32>
    "tpu.trace_stop"() : () -> ()
    %cst_40 = arith.constant dense<0xFF800000> : vector<4x1xf32>
    %182 = vector.multi_reduction <maximumf>, %181, %cst_40 [2] : vector<4x1x1xf32> to vector<4x1xf32>
    %183 = vector.shape_cast %182 : vector<4x1xf32> to vector<4x1x1xf32>
    %184 = arith.subf %181, %183 : vector<4x1x1xf32>
    %185 = math.exp %184 : vector<4x1x1xf32>
    %cst_41 = arith.constant dense<0.000000e+00> : vector<4x1xf32>
    %186 = vector.multi_reduction <add>, %185, %cst_41 [2] : vector<4x1x1xf32> to vector<4x1xf32>
    %187 = vector.shape_cast %186 : vector<4x1xf32> to vector<4x1x1xf32>
    %188 = arith.divf %185, %187 : vector<4x1x1xf32>
    %189 = arith.truncf %188 : vector<4x1x1xf32> to vector<4x1x1xbf16>
    %190 = arith.truncf %178 : vector<4x1x8xf32> to vector<4x1x8xbf16>
    "tpu.trace_start"() <{level = 10 : i32, message = "hqk,hkd->hqd"}> : () -> ()
    %cst_42 = arith.constant dense<0.000000e+00> : vector<4x1x8xf32>
    %191 = tpu.matmul %189, %190, %cst_42 {dimension_numbers = #tpu.dot_dimension_numbers<[2], [1], [1], [2], [0, 0, 0, 1, 1, 2], [0], [0]>} : vector<4x1x1xbf16>, vector<4x1x8xbf16>, vector<4x1x8xf32> -> vector<4x1x8xf32>
    "tpu.trace_stop"() : () -> ()
    %192 = vector.extract_strided_slice %191 {offsets = [0, 0, 0], sizes = [1, 1, 8], strides = [1, 1, 1]} : vector<4x1x8xf32> to vector<1x1x8xf32>
    %193 = vector.shape_cast %192 : vector<1x1x8xf32> to vector<1x8xf32>
    %194 = vector.extract_strided_slice %191 {offsets = [1, 0, 0], sizes = [1, 1, 8], strides = [1, 1, 1]} : vector<4x1x8xf32> to vector<1x1x8xf32>
    %195 = vector.shape_cast %194 : vector<1x1x8xf32> to vector<1x8xf32>
    %196 = vector.extract_strided_slice %191 {offsets = [2, 0, 0], sizes = [1, 1, 8], strides = [1, 1, 1]} : vector<4x1x8xf32> to vector<1x1x8xf32>
    %197 = vector.shape_cast %196 : vector<1x1x8xf32> to vector<1x8xf32>
    %198 = vector.extract_strided_slice %191 {offsets = [3, 0, 0], sizes = [1, 1, 8], strides = [1, 1, 1]} : vector<4x1x8xf32> to vector<1x1x8xf32>
    %199 = vector.shape_cast %198 : vector<1x1x8xf32> to vector<1x8xf32>
    %200 = tpu.concatenate %193, %195, %197, %199 in 1 : vector<1x8xf32>, vector<1x8xf32>, vector<1x8xf32>, vector<1x8xf32> -> vector<1x32xf32>
    %201 = vector.extract_strided_slice %2 {offsets = [1, 0, 0], sizes = [1, 32, 32], strides = [1, 1, 1]} : vector<2x32x32xbf16> to vector<1x32x32xbf16>
    %202 = vector.shape_cast %201 : vector<1x32x32xbf16> to vector<32x32xbf16>
    %203 = arith.truncf %200 : vector<1x32xf32> to vector<1x32xbf16>
    %cst_43 = arith.constant dense<0.000000e+00> : vector<1x32xf32>
    %204 = tpu.matmul %203, %202, %cst_43 {dimension_numbers = #tpu.dot_dimension_numbers<[1], [0], [0], [1], [0, 0, 1, 1], [], []>} : vector<1x32xbf16>, vector<32x32xbf16>, vector<1x32xf32> -> vector<1x32xf32>
    %205 = arith.addf %204, %137 : vector<1x32xf32>
    %206 = arith.addf %133, %205 : vector<1x32xf32>
    %cst_44 = arith.constant dense<0.000000e+00> : vector<1xf32>
    %207 = vector.multi_reduction <add>, %206, %cst_44 [1] : vector<1x32xf32> to vector<1xf32>
    %208 = vector.shape_cast %207 : vector<1xf32> to vector<1x1xf32>
    %cst_45 = arith.constant 3.200000e+01 : f32
    %209 = vector.broadcast %cst_45 : f32 to vector<1x1xf32>
    %210 = arith.divf %208, %209 : vector<1x1xf32>
    %211 = vector.broadcast %210 : vector<1x1xf32> to vector<1x32xf32>
    %212 = arith.subf %206, %211 : vector<1x32xf32>
    %213 = arith.mulf %212, %212 : vector<1x32xf32>
    %cst_46 = arith.constant dense<0.000000e+00> : vector<1xf32>
    %214 = vector.multi_reduction <add>, %213, %cst_46 [1] : vector<1x32xf32> to vector<1xf32>
    %215 = vector.shape_cast %214 : vector<1xf32> to vector<1x1xf32>
    %cst_47 = arith.constant 3.200000e+01 : f32
    %216 = vector.broadcast %cst_47 : f32 to vector<1x1xf32>
    %217 = arith.divf %215, %216 : vector<1x1xf32>
    %218 = vector.broadcast %210 : vector<1x1xf32> to vector<1x32xf32>
    %219 = arith.subf %206, %218 : vector<1x32xf32>
    %cst_48 = arith.constant 9.99999974E-6 : f32
    %220 = vector.broadcast %cst_48 : f32 to vector<1x1xf32>
    %221 = arith.addf %217, %220 : vector<1x1xf32>
    %222 = math.rsqrt %221 : vector<1x1xf32>
    %223 = vector.broadcast %222 : vector<1x1xf32> to vector<1x32xf32>
    %224 = arith.mulf %219, %223 : vector<1x32xf32>
    %225 = arith.mulf %224, %138 : vector<1x32xf32>
    %226 = arith.addf %225, %139 : vector<1x32xf32>
    %227 = vector.extract_strided_slice %3 {offsets = [1, 0, 0], sizes = [1, 32, 128], strides = [1, 1, 1]} : vector<2x32x128xbf16> to vector<1x32x128xbf16>
    %228 = vector.shape_cast %227 : vector<1x32x128xbf16> to vector<32x128xbf16>
    %229 = arith.truncf %226 : vector<1x32xf32> to vector<1x32xbf16>
    %cst_49 = arith.constant dense<0.000000e+00> : vector<1x128xf32>
    %230 = tpu.matmul %229, %228, %cst_49 {dimension_numbers = #tpu.dot_dimension_numbers<[1], [0], [0], [1], [0, 0, 1, 1], [], []>} : vector<1x32xbf16>, vector<32x128xbf16>, vector<1x128xf32> -> vector<1x128xf32>
    %231 = arith.addf %230, %140 : vector<1x128xf32>
    %cst_50 = arith.constant 0.000000e+00 : f32
    %232 = vector.broadcast %cst_50 : f32 to vector<1x128xf32>
    %233 = arith.maximumf %231, %232 : vector<1x128xf32>
    %234 = vector.extract_strided_slice %4 {offsets = [1, 0, 0], sizes = [1, 128, 32], strides = [1, 1, 1]} : vector<2x128x32xbf16> to vector<1x128x32xbf16>
    %235 = vector.shape_cast %234 : vector<1x128x32xbf16> to vector<128x32xbf16>
    %236 = arith.truncf %233 : vector<1x128xf32> to vector<1x128xbf16>
    %cst_51 = arith.constant dense<0.000000e+00> : vector<1x32xf32>
    %237 = tpu.matmul %236, %235, %cst_51 {dimension_numbers = #tpu.dot_dimension_numbers<[1], [0], [0], [1], [0, 0, 1, 1], [], []>} : vector<1x128xbf16>, vector<128x32xbf16>, vector<1x32xf32> -> vector<1x32xf32>
    %238 = arith.addf %237, %141 : vector<1x32xf32>
    %239 = arith.addf %226, %238 : vector<1x32xf32>
    %cst_52 = arith.constant dense<0.000000e+00> : vector<1xf32>
    %240 = vector.multi_reduction <add>, %239, %cst_52 [1] : vector<1x32xf32> to vector<1xf32>
    %241 = vector.shape_cast %240 : vector<1xf32> to vector<1x1xf32>
    %cst_53 = arith.constant 3.200000e+01 : f32
    %242 = vector.broadcast %cst_53 : f32 to vector<1x1xf32>
    %243 = arith.divf %241, %242 : vector<1x1xf32>
    %244 = vector.broadcast %243 : vector<1x1xf32> to vector<1x32xf32>
    %245 = arith.subf %239, %244 : vector<1x32xf32>
    %246 = arith.mulf %245, %245 : vector<1x32xf32>
    %cst_54 = arith.constant dense<0.000000e+00> : vector<1xf32>
    %247 = vector.multi_reduction <add>, %246, %cst_54 [1] : vector<1x32xf32> to vector<1xf32>
    %248 = vector.shape_cast %247 : vector<1xf32> to vector<1x1xf32>
    %cst_55 = arith.constant 3.200000e+01 : f32
    %249 = vector.broadcast %cst_55 : f32 to vector<1x1xf32>
    %250 = arith.divf %248, %249 : vector<1x1xf32>
    %251 = vector.broadcast %243 : vector<1x1xf32> to vector<1x32xf32>
    %252 = arith.subf %239, %251 : vector<1x32xf32>
    %cst_56 = arith.constant 9.99999974E-6 : f32
    %253 = vector.broadcast %cst_56 : f32 to vector<1x1xf32>
    %254 = arith.addf %250, %253 : vector<1x1xf32>
    %255 = math.rsqrt %254 : vector<1x1xf32>
    %256 = vector.broadcast %255 : vector<1x1xf32> to vector<1x32xf32>
    %257 = arith.mulf %252, %256 : vector<1x32xf32>
    %258 = arith.mulf %257, %142 : vector<1x32xf32>
    %259 = arith.addf %258, %143 : vector<1x32xf32>
    %260 = arith.truncf %259 : vector<1x32xf32> to vector<1x32xbf16>
    %cst_57 = arith.constant dense<0.000000e+00> : vector<1x128xf32>
    %261 = tpu.matmul %260, %6, %cst_57 {dimension_numbers = #tpu.dot_dimension_numbers<[1], [0], [0], [1], [0, 0, 1, 1], [], []>} : vector<1x32xbf16>, vector<32x128xbf16>, vector<1x128xf32> -> vector<1x128xf32>
    %262 = arith.addf %261, %7 : vector<1x128xf32>
    %c0_58 = arith.constant 0 : index
    %c0_59 = arith.constant 0 : index
    %263 = vector.load %arg8[%c0_58, %c0_59] : memref<1x128xf32, #tpu.memory_space<vmem>>, vector<1x128xf32>
    tpu.vector_store %arg8[%c0_58, %c0_59], %262 {strides = array<i32>} : memref<1x128xf32, #tpu.memory_space<vmem>>, vector<1x128xf32>,
    return
  }
}

</mosaic_0001>

<bundles_post_ra>
// kernel: tpu_custom_call.1
= control target key start
LH: loop header
LB: loop body
LE: loop exit
PB: predicated region body
PF: predicated region fallthrough
CT: control target
= control target key end

     0   :  { %v2189_v1 = vmov 0.0   ;;  %vm2190_vm0 = vmmov 0   ;;  %vm108_vm1 = vcmask 261120   ;;  %s2573_s0 = inlined_call_operand.vmem [shape: f32[1,32], index: 0, kind: input, shape index: {}]   ;;  %s2574_s1 = inlined_call_operand.vmem [shape: bf16[2,32,96], index: 1, kind: input, shape index: {}]   ;;  %s2575_s2 = inlined_call_operand.vmem [shape: bf16[2,32,32], index: 2, kind: input, shape index: {}]   ;;  %s2576_s3 = inlined_call_operand.vmem [shape: bf16[2,32,128], index: 3, kind: input, shape index: {}]   ;;  %s2577_s4 = inlined_call_operand.vmem [shape: bf16[2,128,32], index: 4, kind: input, shape index: {}]   ;;  %s2578_s5 = inlined_call_operand.vmem [shape: f32[2,8,128], index: 5, kind: input, shape index: {}]   ;;  %s2579_s6 = inlined_call_operand.vmem [shape: bf16[32,128], index: 6, kind: input, shape index: {}]   ;;  %s2580_s7 = inlined_call_operand.vmem [shape: f32[1,128], index: 7, kind: input, shape index: {}]   ;;  %s2581_s8 = inlined_call_operand.hbm [shape: f32[1,128], index: 8, kind: output, shape index: {}]  }
   0x1   :  { %v2095_v0 = vld [vmem:[%s2574_s1 + $0x8] sm:$0xff]   ;;  %1890 = vmatprep.subr.bf16.mxu1 %v2189_v1  ;;  %1904 = vmatprep.subr.bf16.mxu0 %v2189_v1  ;;  %v2096_v2 = vld [vmem:[%s2574_s1] sm:$0xff]  }
   0x2   :  { %1891 = vmatpush3.bf16.msra.mxu1 %v2095_v0  ;;  %1894 = vmatprep.mubr.msk.bf16.mxu1 %vm2190_vm0, %v2189_v1  ;;  %v2260_v3 = vld [vmem:[%s2573_s0] sm:$0x1] }
   0x3   :  { %1892 = vmatprep.subr.bf16.mxu1 %v2189_v1  ;;  %1906 = vmatprep.mubr.msk.bf16.mxu0 %vm2190_vm0, %v2189_v1  ;;  %v95_v4 = vpack.c.bf16 %v2260_v3, %v2260_v3 }
   0x6   :  { %1893 = vmatpush3.bf16.msra.mxu1 %v2096_v2 }
   0x7   :  { %1898 = vmatprep.subr.bf16.mxu1 %v2189_v1 }
   0x9   :  { %1895 = vmatmul.mubr.msk.bf16.vlgmr.msra.gmra.mxu1 %vm108_vm1, %v95_v4 }
   0xa   :  { %1900 = vmatprep.mubr.msk.bf16.mxu1 %vm2190_vm0, %v2189_v1 }
   0xb   :  { %13 = vsyncpa [#allocation3], 0  ;;  %v2274_v5 = vld [vmem:[%s2578_s5] sm:$0xff]  ;;  %s2191_s12 = smov 104   ;;  %s2192_s13 = smov 120   ;;  %vm169_vm2 = vcmask 64512  }
   0xc   :  { %s2193_s14 = smov 112   ;;  %s2194_s15 = smov 96   ;;  %vm397_vm3 = vcmask 1040384   ;;  %v2196_v26 = vmov 0   ;;  %vm393_vm4 = vcmask 7168   ;;  %vm600_vm5 = vcmask 130048  }
   0xd   :  { %s2195_s16 = smov 64   ;;  %v2298_v27 = vsel %vm397_vm3, 65535, %v2196_v26  ;;  %s2197_s21 = smov 8   ;;  %vm602_vm6 = vcmask 195584   ;;  %vm664_vm7 = vcmask 253952  }
   0xe   :  { %s2198_s22 = smov 16   ;;  %s2199_s23 = smov 24  }
  0xc9   :  { %v146_v6 = vpop.f32.mrf.mxu1 }
  0xca   :  { %v147_v7 = vadd.f32 %v146_v6, %v2274_v5 }
  0xcb   :  { %v1896_v8 = vpop.f32.mrf.mxu1 }
  0xcc   :  { %159 = vrot.lane.b32.xlu1 %v147_v7, %s2191_s12  ;;  %153 = vrot.lane.b32.xlu0 %v147_v7, %s2192_s13  ;;  %v162_v10 = vpack.c.bf16 %v147_v7, %v147_v7 }
  0xcd   :  { %v149_v9 = vpop.f32.mrf.mxu1 }
  0xcf   :  { %v1897_v11 = vpop.f32.mrf.mxu1 }
  0xd0   :  { %156 = vrot.lane.b32.xlu0 %v147_v7, %s2193_s14  ;;  %167 = vrot.lane.b32.xlu1 %v162_v10, %s2194_s15 }
 0x13e   :  { %v160_v12 = vpop.permute.xlu1 %159  ;;  %v154_v13 = vpop.permute.xlu0 %153 }
 0x13f   :  { %v163_v14 = vpack.c.bf16 %v154_v13, %v154_v13  ;;  %v165_v17 = vpack.c.bf16 %v160_v12, %v160_v12 }
 0x141   :  { %217 = vrot.lane.b32.xlu0 %v163_v14, %s2194_s15 }
 0x142   :  { %v157_v15 = vpop.permute.xlu0 %156  ;;  %v168_v16 = vpop.permute.xlu1 %167 }
 0x143   :  { %v164_v18 = vpack.c.bf16 %v157_v15, %v157_v15  ;;  %v174_v19 = vsel %vm169_vm2, %v168_v16, 0 }
 0x144   :  { %1899 = vmatpush3.bf16.xpose.msra.mxu1 %v174_v19  ;;  %v2098_v19 = vld [vmem:[%s2575_s2 + $0x8] sm:$0xff]  }
 0x145   :  { %315 = vrot.lane.b32.xlu0 %v165_v17, %s2194_s15  ;;  %266 = vrot.lane.b32.xlu1 %v164_v18, %s2194_s15 }
 0x146   :  { %1910 = vmatprep.subr.bf16.mxu1 %v2189_v1 }
 0x149   :  { %443 = vrot.lane.b32.xlu0 %v163_v14, %s2195_s16  ;;  %391 = vrot.lane.b32.xlu1 %v162_v10, %s2195_s16 }
 0x14b   :  { %1901 = vmatmul.mubr.msk.bf16.vlgmr.msra.gmra.mxu1 %vm169_vm2, %v162_v10 }
 0x14c   :  { %1912 = vmatprep.mubr.msk.bf16.mxu1 %vm2190_vm0, %v2189_v1 }
 0x14d   :  { %539 = vrot.lane.b32.xlu0 %v165_v17, %s2195_s16  ;;  %491 = vrot.lane.b32.xlu1 %v164_v18, %s2195_s16 }
 0x1b3   :  { %v218_v20 = vpop.permute.xlu0 %217 }
 0x1b4   :  { %v223_v21 = vsel %vm169_vm2, %v218_v20, 0  ;;  %v2099_v20 = vld [vmem:[%s2575_s2] sm:$0xff]  }
 0x1b5   :  { %1905 = vmatpush3.bf16.xpose.msra.mxu0 %v223_v21 }
 0x1b6   :  { %1916 = vmatprep.subr.bf16.mxu0 %v2189_v1 }
 0x1b7   :  { %v267_v22 = vpop.permute.xlu1 %266  ;;  %v316_v24 = vpop.permute.xlu0 %315 }
 0x1b8   :  { %v272_v23 = vsel %vm169_vm2, %v267_v22, 0  ;;  %v321_v25 = vsel %vm169_vm2, %v316_v24, 0 }
 0x1b9   :  { %1911 = vmatpush3.bf16.xpose.msra.mxu1 %v272_v23 }
 0x1ba   :  { %1922 = vmatprep.subr.bf16.mxu1 %v2189_v1 }
 0x1bb   :  { %v392_v28 = vpop.permute.xlu1 %391  ;;  %v444_v30 = vpop.permute.xlu0 %443 }
 0x1bc   :  { %1907 = vmatmul.mubr.msk.bf16.vlgmr.msra.gmra.mxu0 %vm169_vm2, %v163_v14  ;;  %v401_v29 = vand.u32 %v2298_v27, %v392_v28  ;;  %v449_v31 = vand.u32 %v444_v30, %v2298_v27 }
 0x1bd   :  { %1917 = vmatpush3.bf16.xpose.msra.mxu0 %v321_v25  ;;  %1918 = vmatprep.mubr.msk.bf16.mxu0 %vm2190_vm0, %v2189_v1 }
 0x1be   :  { %1928 = vmatprep.subr.bf16.mxu0 %v2189_v1 }
 0x1bf   :  { %v492_v40 = vpop.permute.xlu1 %491  ;;  %v540_v4 = vpop.permute.xlu0 %539 }
 0x1c0   :  { %1913 = vmatmul.mubr.msk.bf16.vlgmr.msra.gmra.mxu1 %vm169_vm2, %v164_v18  ;;  %v497_v43 = vand.u32 %v492_v40, %v2298_v27  ;;  %v545_v9 = vand.u32 %v540_v4, %v2298_v27 }
 0x1c1   :  { %1923 = vmatpush3.bf16.msra.mxu1 %v401_v29  ;;  %1924 = vmatprep.mubr.msk.bf16.mxu1 %vm2190_vm0, %v2189_v1 }
 0x1c2   :  { %1934 = vmatprep.subr.bf16.mxu1 %v2189_v1 }
 0x1c4   :  { %1919 = vmatmul.mubr.msk.bf16.vlgmr.msra.gmra.mxu0 %vm169_vm2, %v165_v17 }
 0x1c5   :  { %1929 = vmatpush3.bf16.msra.mxu0 %v449_v31  ;;  %1930 = vmatprep.mubr.msk.bf16.mxu0 %vm2190_vm0, %v2189_v1 }
 0x1c6   :  { %1940 = vmatprep.subr.bf16.mxu0 %v2189_v1 }
 0x20b   :  { %v210_v32 = vpop.f32.mrf.mxu1 }
 0x20c   :  { %v363_v33 = vsub.f32 %v210_v32, %v210_v32 }
 0x20d   :  { %v1902_v34 = vpop.f32.mrf.mxu1 }
 0x20e   :  { %v367_v35 = vmul.f32 1.442695, %v363_v33 }
 0x20f   :  { %v213_v36 = vpop.f32.mrf.mxu1 }
 0x210   :  { %2127 = vpow2.f32 %v367_v35 }
 0x211   :  { %v1903_v37 = vpop.f32.mrf.mxu1 }
 0x21d   :  { %v2128_v38 = vpop.eup %2127 }
 0x21e   :  { %2129 = vrcp.f32 %v2128_v38 }
 0x22b   :  { %v2130_v39 = vpop.eup %2129 }
 0x22c   :  { %v380_v41 = vmul.f32 %v2130_v39, %v2128_v38 }
 0x22e   :  { %v387_v42 = vpack.c.bf16 %v380_v41, %v380_v41  ;;  %v618_v41 = vrot.slane %v2274_v5, 1 }
 0x230   :  { %1925 = vmatmul.mubr.msk.bf16.vlgmr.msra.gmra.mxu1 %vm393_vm4, %v387_v42 }
 0x231   :  { %1935 = vmatpush3.bf16.msra.mxu1 %v497_v43  ;;  %1936 = vmatprep.mubr.msk.bf16.mxu1 %vm2190_vm0, %v2189_v1 }
 0x232   :  { %1946 = vmatprep.subr.bf16.mxu1 %v2189_v1 }
 0x27c   :  { %v259_v44 = vpop.f32.mrf.mxu0 }
 0x27d   :  { %v364_v45 = vsub.f32 %v259_v44, %v259_v44 }
 0x27e   :  { %v1908_v46 = vpop.f32.mrf.mxu0 }
 0x27f   :  { %v369_v47 = vmul.f32 1.442695, %v364_v45 }
 0x280   :  { %v262_v48 = vpop.f32.mrf.mxu0  ;;  %v308_v49 = vpop.f32.mrf.mxu1 }
 0x281   :  { %2131 = vpow2.f32 %v369_v47  ;;  %v365_v50 = vsub.f32 %v308_v49, %v308_v49 }
 0x282   :  { %v1909_v51 = vpop.f32.mrf.mxu0  ;;  %v1914_v52 = vpop.f32.mrf.mxu1 }
 0x283   :  { %v371_v53 = vmul.f32 1.442695, %v365_v50 }
 0x284   :  { %v311_v54 = vpop.f32.mrf.mxu1  ;;  %v357_v55 = vpop.f32.mrf.mxu0 }
 0x285   :  { %2133 = vpow2.f32 %v371_v53  ;;  %v366_v56 = vsub.f32 %v357_v55, %v357_v55  ;;  %v2100_v54 = vld [vmem:[%s2576_s3 + $0x8] sm:$0xff]   ;;  %v2102_v55 = vld [vmem:[%s2577_s4 + $0x38] sm:$0xff]  }
 0x286   :  { %v1915_v57 = vpop.f32.mrf.mxu1  ;;  %v1920_v58 = vpop.f32.mrf.mxu0 }
 0x287   :  { %v373_v59 = vmul.f32 1.442695, %v366_v56  ;;  %v2103_v56 = vld [vmem:[%s2577_s4 + $0x30] sm:$0xff]   ;;  %v2104_v57 = vld [vmem:[%s2577_s4 + $0x28] sm:$0xff]   ;;  %v2105_v58 = vld [vmem:[%s2577_s4 + $0x20] sm:$0xff]  }
 0x288   :  { %v360_v60 = vpop.f32.mrf.mxu0 }
 0x289   :  { %2135 = vpow2.f32 %v373_v59  ;;  %v2106_v59 = vld [vmem:[%s2577_s4 + $0x18] sm:$0xff]   ;;  %v2107_v60 = vld [vmem:[%s2577_s4 + $0x10] sm:$0xff]  }
 0x28a   :  { %v1921_v61 = vpop.f32.mrf.mxu0 }
 0x28b   :  { %v2200_v61 = vmov 1966171168  }
 0x28e   :  { %v2132_v62 = vpop.eup %2131 }
 0x28f   :  { %2137 = vrcp.f32 %v2132_v62 }
 0x292   :  { %v2134_v63 = vpop.eup %2133 }
 0x293   :  { %2139 = vrcp.f32 %v2134_v63 }
 0x296   :  { %v2136_v0 = vpop.eup %2135 }
 0x297   :  { %2141 = vrcp.f32 %v2136_v0 }
 0x29c   :  { %v2138_v2 = vpop.eup %2137 }
 0x29d   :  { %v382_v6 = vmul.f32 %v2138_v2, %v2132_v62  ;;  %v680_v62 = vunpack.c.l.s4 %v2200_v61 }
 0x29f   :  { %v388_v7 = vpack.c.bf16 %v382_v6, %v382_v6 }
 0x2a0   :  { %v2140_v8 = vpop.eup %2139 }
 0x2a1   :  { %1931 = vmatmul.mubr.msk.bf16.vlgmr.msra.gmra.mxu0 %vm393_vm4, %v388_v7  ;;  %v384_v10 = vmul.f32 %v2140_v8, %v2134_v63  ;;  %v682_v63 = vlaneseq }
 0x2a2   :  { %1941 = vmatpush3.bf16.msra.mxu0 %v545_v9  ;;  %1942 = vmatprep.mubr.msk.bf16.mxu0 %vm2190_vm0, %v2189_v1 }
 0x2a3   :  { %v389_v11 = vpack.c.bf16 %v384_v10, %v384_v10  ;;  %1954 = vmatprep.subr.bf16.mxu0 %v2189_v1  ;;  %v683_v2 = vshrl.u32 %v682_v63, 7 }
 0x2a4   :  { %v2142_v12 = vpop.eup %2141 }
 0x2a5   :  { %1937 = vmatmul.mubr.msk.bf16.vlgmr.msra.gmra.mxu1 %vm393_vm4, %v389_v11  ;;  %v386_v13 = vmul.f32 %v2142_v12, %v2136_v0  ;;  %v681_v0 = vunpack.c.0.s8 %v680_v62 }
 0x2a6   :  { %1950 = vmatprep.mubr.msk.bf16.mxu1 %vm2190_vm0, %v2189_v1  ;;  %1947 = vmatpush3.bf16.msra.mxu1 %v2098_v19 }
 0x2a7   :  { %v390_v14 = vpack.c.bf16 %v386_v13, %v386_v13  ;;  %1948 = vmatprep.subr.bf16.mxu1 %v2189_v1  ;;  %v2383_v7 = vsub.s32 %v681_v0, %v683_v2 }
 0x2a9   :  { %1943 = vmatmul.mubr.msk.bf16.vlgmr.msra.gmra.mxu0 %vm393_vm4, %v390_v14  ;;  %v685_v9 = vrot.slane %v2274_v5, %v2383_v7 }
 0x2aa   :  { %1958 = vmatprep.mubr.msk.bf16.mxu0 %vm2190_vm0, %v2189_v1  ;;  %1949 = vmatpush3.bf16.msra.mxu1 %v2099_v20  ;;  %v2108_v20 = vld [vmem:[%s2577_s4 + $0x8] sm:$0xff]  }
 0x2ab   :  { %1962 = vmatprep.subr.bf16.mxu1 %v2189_v1  ;;  %1955 = vmatpush3.bf16.msra.mxu0 %v2100_v54  ;;  %v696_v10 = vcombine.high %v685_v9, %v685_v9  ;;  %v692_v11 = vrot.slane %v685_v9, %v2383_v7 }
 0x2ac   :  { %1956 = vmatprep.subr.bf16.mxu0 %v2189_v1 }
 0x2ad   :  { %v703_v12 = vrot.slane %v696_v10, %v2383_v7  ;;  %v693_v13 = vcombine.high %v692_v11, %v692_v11 }
 0x2f0   :  { %v437_v15 = vpop.f32.mrf.mxu1 }
 0x2f2   :  { %v1926_v16 = vpop.f32.mrf.mxu1 }
 0x2f3   :  { %v704_v16 = vcombine.high %v703_v12, %v703_v12 }
 0x2f4   :  { %v440_v17 = vpop.f32.mrf.mxu1 }
 0x2f6   :  { %v1927_v18 = vpop.f32.mrf.mxu1 }
 0x361   :  { %v485_v21 = vpop.f32.mrf.mxu0 }
 0x362   :  { %588 = vrot.lane.b32.xlu1 %v485_v21, %s2197_s21  ;;  %v2109_v21 = vld [vmem:[%s2577_s4] sm:$0xff]  }
 0x363   :  { %v1932_v22 = vpop.f32.mrf.mxu0 }
 0x364   :  { %v720_v22 = vrot.slane %v2274_v5, 4 }
 0x365   :  { %v488_v23 = vpop.f32.mrf.mxu0  ;;  %v533_v24 = vpop.f32.mrf.mxu1 }
 0x366   :  { %592 = vrot.lane.b32.xlu0 %v533_v24, %s2198_s22 }
 0x367   :  { %v1933_v25 = vpop.f32.mrf.mxu0  ;;  %v1938_v26 = vpop.f32.mrf.mxu1 }
 0x369   :  { %v536_v28 = vpop.f32.mrf.mxu1  ;;  %v581_v29 = vpop.f32.mrf.mxu0 }
 0x36a   :  { %596 = vrot.lane.b32.xlu1 %v581_v29, %s2199_s23 }
 0x36b   :  { %v1939_v30 = vpop.f32.mrf.mxu1  ;;  %v1944_v31 = vpop.f32.mrf.mxu0 }
 0x36c   :  { %v815_v31 = vrot.slane %v2274_v5, 5 }
 0x36d   :  { %v584_v32 = vpop.f32.mrf.mxu0 }
 0x36f   :  { %v1945_v33 = vpop.f32.mrf.mxu0 }
 0x3d4   :  { %v589_v34 = vpop.permute.xlu1 %588 }
 0x3d5   :  { %v599_v36 = vsel %vm169_vm2, %v437_v15, %v589_v34 }
 0x3d8   :  { %v593_v35 = vpop.permute.xlu0 %592 }
 0x3d9   :  { %v601_v37 = vsel %vm600_vm5, %v599_v36, %v593_v35 }
 0x3dc   :  { %v597_v38 = vpop.permute.xlu1 %596 }
 0x3dd   :  { %v603_v39 = vsel %vm602_vm6, %v601_v37, %v597_v38 }
 0x3de   :  { %v604_v40 = vpack.c.bf16 %v603_v39, %v603_v39 }
 0x3e0   :  { %1951 = vmatmul.mubr.msk.bf16.vlgmr.msra.gmra.mxu1 %vm108_vm1, %v604_v40 }
 0x3e1   :  { %1978 = vmatprep.mubr.msk.bf16.mxu1 %vm2190_vm0, %v2189_v1  ;;  %1963 = vmatpush3.bf16.msra.mxu1 %v2102_v55 }
 0x3e2   :  { %1964 = vmatprep.subr.bf16.mxu1 %v2189_v1 }
 0x3e5   :  { %1965 = vmatpush3.bf16.msra.mxu1 %v2103_v56 }
 0x3e6   :  { %1966 = vmatprep.subr.bf16.mxu1 %v2189_v1 }
 0x3e9   :  { %1967 = vmatpush3.bf16.msra.mxu1 %v2104_v57 }
 0x3ea   :  { %1968 = vmatprep.subr.bf16.mxu1 %v2189_v1 }
 0x3ed   :  { %1969 = vmatpush3.bf16.msra.mxu1 %v2105_v58 }
 0x3ee   :  { %1970 = vmatprep.subr.bf16.mxu1 %v2189_v1 }
 0x3f1   :  { %1971 = vmatpush3.bf16.msra.mxu1 %v2106_v59 }
 0x3f2   :  { %1972 = vmatprep.subr.bf16.mxu1 %v2189_v1 }
 0x3f5   :  { %1973 = vmatpush3.bf16.msra.mxu1 %v2107_v60 }
 0x3f6   :  { %1974 = vmatprep.subr.bf16.mxu1 %v2189_v1 }
 0x3f9   :  { %1975 = vmatpush3.bf16.msra.mxu1 %v2108_v20 }
 0x3fa   :  { %1976 = vmatprep.subr.bf16.mxu1 %v2189_v1 }
 0x3fd   :  { %1977 = vmatpush3.bf16.msra.mxu1 %v2109_v21 }
 0x3fe   :  { %2008 = vmatprep.subr.bf16.mxu1 %v2189_v1 }
 0x4a0   :  { %v657_v42 = vpop.f32.mrf.mxu1 }
 0x4a1   :  { %v658_v43 = vadd.f32 %v657_v42, %v618_v41 }
 0x4a2   :  { %v1952_v44 = vpop.f32.mrf.mxu1 }
 0x4a3   :  { %v663_v45 = vadd.f32 %v658_v43, %v2260_v3  ;;  %v2101_v3 = vld [vmem:[%s2576_s3] sm:$0xff]   ;;  %v2110_v44 = vld [vmem:[%s2574_s1 + $0x18] sm:$0xff]  }
 0x4a4   :  { %v660_v46 = vpop.f32.mrf.mxu1  ;;  %1957 = vmatpush3.bf16.msra.mxu0 %v2101_v3 }
 0x4a5   :  { %v665_v47 = vsel %vm664_vm7, %v663_v45, 0.0  ;;  %1982 = vmatprep.subr.bf16.mxu0 %v2189_v1 }
 0x4a6   :  { %666 = vadd.xlane.f32.xlu0 %v665_v47  ;;  %v1953_v48 = vpop.f32.mrf.mxu1 }
 0x4a7   :  { %v871_v48 = vcombine.high %v2274_v5, %v2274_v5  ;;  %v2429_v5 = vld [vmem:[%s2578_s5 + $0x8] sm:$0xff] }
 0x52f   :  { %v667_v49 = vpop.xlane.xlu0 %666 }
 0x530   :  { %v669_v50 = vmul.f32 0.03125, %v667_v49 }
 0x532   :  { %v670_v51 = vsub.f32 %v663_v45, %v669_v50  ;;  %v2111_v45 = vld [vmem:[%s2574_s1 + $0x10] sm:$0xff]   ;;  %v878_v50 = vrot.slane %v871_v48, %v2383_v7 }
 0x534   :  { %v671_v52 = vmul.f32 %v670_v51, %v670_v51 }
 0x536   :  { %v672_v53 = vsel %vm664_vm7, %v671_v52, 0.0  ;;  %v885_v52 = vrot.slane %v878_v50, %v2383_v7 }
 0x537   :  { %673 = vadd.xlane.f32.xlu1 %v672_v53 }
 0x538   :  { %v886_v54 = vcombine.high %v885_v52, %v885_v52 }
 0x5c0   :  { %v674_v4 = vpop.xlane.xlu1 %673 }
 0x5c1   :  { %v675_v6 = vmul.f32 0.03125, %v674_v4 }
 0x5c3   :  { %v676_v8 = vadd.f32 1e-05, %v675_v6 }
 0x5c5   :  { %2143 = vrsqrt.f32 %v676_v8 }
 0x5d2   :  { %v2144_v14 = vpop.eup %2143 }
 0x5d3   :  { %v678_v15 = vmul.f32 %v2144_v14, %v670_v51  ;;  %v889_v51 = vcombine.high %v878_v50, %v878_v50 }
 0x5d5   :  { %v695_v17 = vmul.f32 %v693_v13, %v678_v15  ;;  %v896_v53 = vrot.slane %v889_v51, %v2383_v7 }
 0x5d7   :  { %v706_v18 = vadd.f32 %v704_v16, %v695_v17  ;;  %v897_v56 = vcombine.high %v896_v53, %v896_v53 }
 0x5d9   :  { %v707_v19 = vpack.c.bf16 %v706_v18, %v706_v18 }
 0x5db   :  { %1959 = vmatmul.mubr.msk.bf16.vlgmr.msra.gmra.mxu0 %vm108_vm1, %v707_v19 }
 0x5dc   :  { %1986 = vmatprep.mubr.msk.bf16.mxu0 %vm2190_vm0, %v2189_v1  ;;  %1983 = vmatpush3.bf16.msra.mxu0 %v2110_v44 }
 0x5dd   :  { %1984 = vmatprep.subr.bf16.mxu0 %v2189_v1 }
 0x5e0   :  { %1985 = vmatpush3.bf16.msra.mxu0 %v2111_v45 }
 0x5e1   :  { %1990 = vmatprep.subr.bf16.mxu0 %v2189_v1 }
 0x69b   :  { %v759_v23 = vpop.f32.mrf.mxu0 }
 0x69c   :  { %v760_v24 = vadd.f32 %v759_v23, %v720_v22 }
 0x69d   :  { %v1960_v25 = vpop.f32.mrf.mxu0 }
 0x69e   :  { %v765_v26 = vmax.f32 %v760_v24, 0.0 }
 0x69f   :  { %v762_v28 = vpop.f32.mrf.mxu0 }
 0x6a0   :  { %v766_v29 = vpack.c.bf16 %v765_v26, %v765_v26 }
 0x6a1   :  { %v1961_v30 = vpop.f32.mrf.mxu0 }
 0x6a2   :  { %1979 = vmatmul.mubr.bf16.vlgmr.msra.gmra.mxu1 %v766_v29 }
 0x6a3   :  { %2010 = vmatprep.mubr.msk.bf16.mxu1 %vm2190_vm0, %v2189_v1 }
 0x762   :  { %v851_v32 = vpop.f32.mrf.mxu1 }
 0x763   :  { %v852_v33 = vadd.f32 %v851_v32, %v815_v31 }
 0x764   :  { %v1980_v34 = vpop.f32.mrf.mxu1 }
 0x765   :  { %v857_v35 = vadd.f32 %v852_v33, %v706_v18 }
 0x766   :  { %v854_v36 = vpop.f32.mrf.mxu1 }
 0x767   :  { %v858_v37 = vsel %vm664_vm7, %v857_v35, 0.0 }
 0x768   :  { %859 = vadd.xlane.f32.xlu0 %v858_v37  ;;  %v1981_v38 = vpop.f32.mrf.mxu1 }
 0x7f1   :  { %v860_v39 = vpop.xlane.xlu0 %859 }
 0x7f2   :  { %v861_v40 = vmul.f32 0.03125, %v860_v39 }
 0x7f4   :  { %v862_v41 = vsub.f32 %v857_v35, %v861_v40 }
 0x7f6   :  { %v863_v42 = vmul.f32 %v862_v41, %v862_v41 }
 0x7f8   :  { %v864_v43 = vsel %vm664_vm7, %v863_v42, 0.0 }
 0x7f9   :  { %865 = vadd.xlane.f32.xlu0 %v864_v43 }
 0x882   :  { %v866_v46 = vpop.xlane.xlu0 %865 }
 0x883   :  { %v867_v47 = vmul.f32 0.03125, %v866_v46 }
 0x885   :  { %v868_v49 = vadd.f32 1e-05, %v867_v47 }
 0x887   :  { %2145 = vrsqrt.f32 %v868_v49 }
 0x894   :  { %v2146_v3 = vpop.eup %2145 }
 0x895   :  { %v870_v55 = vmul.f32 %v2146_v3, %v862_v41 }
 0x897   :  { %v888_v57 = vmul.f32 %v886_v54, %v870_v55 }
 0x899   :  { %v2419_v58 = vadd.f32 %v897_v56, %v888_v57 }
 0x89b   :  { %v900_v59 = vpack.c.bf16 %v2419_v58, %v2419_v58 }
 0x89d   :  { %1987 = vmatmul.mubr.msk.bf16.vlgmr.msra.gmra.mxu0 %vm108_vm1, %v900_v59 }
 0x89e   :  { %1992 = vmatprep.mubr.msk.bf16.mxu0 %vm2190_vm0, %v2189_v1 }
 0x95d   :  { %v950_v60 = vpop.f32.mrf.mxu0 }
 0x95e   :  { %v951_v61 = vadd.f32 %v950_v60, %v2429_v5 }
 0x95f   :  { %v1988_v62 = vpop.f32.mrf.mxu0 }
 0x960   :  { %960 = vrot.lane.b32.xlu0 %v951_v61, %s2193_s14  ;;  %957 = vrot.lane.b32.xlu1 %v951_v61, %s2192_s13  ;;  %v966_v2 = vpack.c.bf16 %v951_v61, %v951_v61 }
 0x961   :  { %v953_v63 = vpop.f32.mrf.mxu0 }
 0x963   :  { %v1989_v0 = vpop.f32.mrf.mxu0 }
 0x964   :  { %963 = vrot.lane.b32.xlu1 %v951_v61, %s2191_s12  ;;  %s2201_s12 = smov [#allocation2]  }
 0x965   :  { %s1758_s13 = sshll.u32 %s2201_s12, 4  ;;  %s1759_s13 = int_to_ptr.vmem [resolvable:$true] %s1758_s13 }
 0x966   :  { %s2167_s14 = scalar_lea.vmem %s1759_s13, 16  ;;  %p2172_p1 = scmp.lt.s32.totalorder %s1759_s13, %s1759_s13 }
 0x967   :  { %p2168_p0 = scmp.ne.s32.totalorder %s1759_s13, %s2167_s14 }
 0x968   :  { %971 = vrot.lane.b32.xlu1 %v966_v2, %s2194_s15 }
 0x9d2   :  { %v961_v4 = vpop.permute.xlu0 %960  ;;  %v958_v6 = vpop.permute.xlu1 %957 }
 0x9d3   :  { %v968_v8 = vpack.c.bf16 %v961_v4, %v961_v4  ;;  %v967_v9 = vpack.c.bf16 %v958_v6, %v958_v6 }
 0x9d5   :  { %1020 = vrot.lane.b32.xlu0 %v967_v9, %s2194_s15  ;;  %1069 = vrot.lane.b32.xlu1 %v968_v8, %s2194_s15 }
 0x9d6   :  { %v964_v10 = vpop.permute.xlu1 %963 }
 0x9d7   :  { %v969_v11 = vpack.c.bf16 %v964_v10, %v964_v10 }
 0x9d9   :  { %1118 = vrot.lane.b32.xlu0 %v969_v11, %s2194_s15  ;;  %1194 = vrot.lane.b32.xlu1 %v966_v2, %s2195_s16 }
 0x9da   :  { %v972_v12 = vpop.permute.xlu1 %971 }
 0x9db   :  { %v977_v13 = vsel %vm169_vm2, %v972_v12, 0  ;;  %v2113_v12 = vld [vmem:[%s2575_s2 + $0x18] sm:$0xff]  }
 0x9dc   :  { %1991 = vmatpush3.bf16.xpose.msra.mxu0 %v977_v13  ;;  %v2114_v13 = vld [vmem:[%s2575_s2 + $0x10] sm:$0xff]   ;;  %s2171_s2 = scalar_lea.vmem %s1759_s13, 32 }
 0x9dd   :  { %1242 = vrot.lane.b32.xlu0 %v967_v9, %s2195_s16  ;;  %1290 = vrot.lane.b32.xlu1 %v968_v8, %s2195_s16  ;;  %p2173_p2 = scmp.lt.s32.totalorder %s2171_s2, %s2167_s14 }
 0x9de   :  { %1996 = vmatprep.subr.bf16.mxu0 %v2189_v1 }
 0x9df   :  { %p2174_p3 = por %p2173_p2, %p2172_p1 }
 0x9e1   :  { %1338 = vrot.lane.b32.xlu0 %v969_v11, %s2195_s16  ;;  %p2175_p4 = pnand %p2174_p3, %p2168_p0 }
 0x9e3   :  { %1993 = vmatmul.mubr.msk.bf16.vlgmr.msra.gmra.mxu0 %vm169_vm2, %v966_v2 }
 0x9e4   :  { %1998 = vmatprep.mubr.msk.bf16.mxu0 %vm2190_vm0, %v2189_v1 }
 0xa47   :  { %v1021_v14 = vpop.permute.xlu0 %1020  ;;  %v1070_v18 = vpop.permute.xlu1 %1069 }
 0xa48   :  { %v1026_v15 = vsel %vm169_vm2, %v1021_v14, 0  ;;  %v1075_v19 = vsel %vm169_vm2, %v1070_v18, 0 }
 0xa49   :  { %1997 = vmatpush3.bf16.xpose.msra.mxu0 %v1026_v15 }
 0xa4a   :  { %2002 = vmatprep.subr.bf16.mxu0 %v2189_v1 }
 0xa4b   :  { %v1119_v16 = vpop.permute.xlu0 %1118  ;;  %v1195_v22 = vpop.permute.xlu1 %1194 }
 0xa4c   :  { %v1124_v17 = vsel %vm169_vm2, %v1119_v16, 0  ;;  %v1200_v23 = vand.u32 %v1195_v22, %v2298_v27 }
 0xa4d   :  { %2009 = vmatpush3.bf16.xpose.msra.mxu1 %v1124_v17 }
 0xa4e   :  { %2020 = vmatprep.subr.bf16.mxu1 %v2189_v1 }
 0xa4f   :  { %v1243_v20 = vpop.permute.xlu0 %1242  ;;  %v1291_v33 = vpop.permute.xlu1 %1290 }
 0xa50   :  { %1999 = vmatmul.mubr.msk.bf16.vlgmr.msra.gmra.mxu0 %vm169_vm2, %v967_v9  ;;  %v1248_v21 = vand.u32 %v1243_v20, %v2298_v27  ;;  %v1296_v36 = vand.u32 %v1291_v33, %v2298_v27 }
 0xa51   :  { %2003 = vmatpush3.bf16.xpose.msra.mxu0 %v1075_v19  ;;  %2004 = vmatprep.mubr.msk.bf16.mxu0 %vm2190_vm0, %v2189_v1 }
 0xa52   :  { %2014 = vmatprep.subr.bf16.mxu0 %v2189_v1 }
 0xa53   :  { %v1339_v59 = vpop.permute.xlu0 %1338 }
 0xa54   :  { %2011 = vmatmul.mubr.msk.bf16.vlgmr.msra.gmra.mxu1 %vm169_vm2, %v969_v11  ;;  %v1344_v63 = vand.u32 %v1339_v59, %v2298_v27 }
 0xa55   :  { %2021 = vmatpush3.bf16.msra.mxu1 %v1248_v21  ;;  %2022 = vmatprep.mubr.msk.bf16.mxu1 %vm2190_vm0, %v2189_v1 }
 0xa56   :  { %2032 = vmatprep.subr.bf16.mxu1 %v2189_v1 }
 0xa58   :  { %2005 = vmatmul.mubr.msk.bf16.vlgmr.msra.gmra.mxu0 %vm169_vm2, %v968_v8 }
 0xa59   :  { %2015 = vmatpush3.bf16.msra.mxu0 %v1200_v23  ;;  %2016 = vmatprep.mubr.msk.bf16.mxu0 %vm2190_vm0, %v2189_v1 }
 0xa5a   :  { %2026 = vmatprep.subr.bf16.mxu0 %v2189_v1 }
 0xaa3   :  { %v1013_v24 = vpop.f32.mrf.mxu0 }
 0xaa4   :  { %v1166_v25 = vsub.f32 %v1013_v24, %v1013_v24 }
 0xaa5   :  { %v1994_v26 = vpop.f32.mrf.mxu0 }
 0xaa6   :  { %v1170_v28 = vmul.f32 1.442695, %v1166_v25 }
 0xaa7   :  { %v1016_v29 = vpop.f32.mrf.mxu0 }
 0xaa8   :  { %2147 = vpow2.f32 %v1170_v28 }
 0xaa9   :  { %v1995_v30 = vpop.f32.mrf.mxu0 }
 0xab5   :  { %v2148_v31 = vpop.eup %2147 }
 0xab6   :  { %2149 = vrcp.f32 %v2148_v31 }
 0xac3   :  { %v2150_v32 = vpop.eup %2149 }
 0xac4   :  { %v1183_v34 = vmul.f32 %v2150_v32, %v2148_v31 }
 0xac6   :  { %v1190_v35 = vpack.c.bf16 %v1183_v34, %v1183_v34  ;;  %v1415_v34 = vrot.slane %v2429_v5, 1 }
 0xac8   :  { %2017 = vmatmul.mubr.msk.bf16.vlgmr.msra.gmra.mxu0 %vm393_vm4, %v1190_v35 }
 0xac9   :  { %2027 = vmatpush3.bf16.msra.mxu0 %v1296_v36  ;;  %2028 = vmatprep.mubr.msk.bf16.mxu0 %vm2190_vm0, %v2189_v1 }
 0xaca   :  { %2038 = vmatprep.subr.bf16.mxu0 %v2189_v1 }
 0xb10   :  { %v1062_v37 = vpop.f32.mrf.mxu0 }
 0xb11   :  { %v1167_v38 = vsub.f32 %v1062_v37, %v1062_v37 }
 0xb12   :  { %v2000_v39 = vpop.f32.mrf.mxu0 }
 0xb13   :  { %v1172_v40 = vmul.f32 1.442695, %v1167_v38 }
 0xb14   :  { %v1065_v41 = vpop.f32.mrf.mxu0  ;;  %v1160_v42 = vpop.f32.mrf.mxu1 }
 0xb15   :  { %2151 = vpow2.f32 %v1172_v40  ;;  %v1169_v43 = vsub.f32 %v1160_v42, %v1160_v42 }
 0xb16   :  { %v2001_v44 = vpop.f32.mrf.mxu0  ;;  %v2012_v45 = vpop.f32.mrf.mxu1 }
 0xb17   :  { %v1176_v46 = vmul.f32 1.442695, %v1169_v43 }
 0xb18   :  { %v1111_v47 = vpop.f32.mrf.mxu0  ;;  %v1163_v48 = vpop.f32.mrf.mxu1 }
 0xb19   :  { %2153 = vpow2.f32 %v1176_v46  ;;  %v1168_v49 = vsub.f32 %v1111_v47, %v1111_v47  ;;  %v2115_v47 = vld [vmem:[%s2576_s3 + $0x18] sm:$0xff]  }
 0xb1a   :  { %v2006_v50 = vpop.f32.mrf.mxu0  ;;  %v2013_v51 = vpop.f32.mrf.mxu1  ;;  %v2117_v48 = vld [vmem:[%s2577_s4 + $0x78] sm:$0xff]  }
 0xb1b   :  { %v1174_v52 = vmul.f32 1.442695, %v1168_v49  ;;  %v2118_v49 = vld [vmem:[%s2577_s4 + $0x70] sm:$0xff]   ;;  %v2119_v50 = vld [vmem:[%s2577_s4 + $0x68] sm:$0xff]   ;;  %v2120_v51 = vld [vmem:[%s2577_s4 + $0x60] sm:$0xff]  }
 0xb1c   :  { %v1114_v53 = vpop.f32.mrf.mxu0 }
 0xb1d   :  { %2155 = vpow2.f32 %v1174_v52  ;;  %v2121_v52 = vld [vmem:[%s2577_s4 + $0x58] sm:$0xff]   ;;  %v2122_v53 = vld [vmem:[%s2577_s4 + $0x50] sm:$0xff]  }
 0xb1e   :  { %v2007_v54 = vpop.f32.mrf.mxu0 }
 0xb22   :  { %v2152_v3 = vpop.eup %2151 }
 0xb23   :  { %2157 = vrcp.f32 %v2152_v3 }
 0xb26   :  { %v2154_v55 = vpop.eup %2153 }
 0xb27   :  { %2159 = vrcp.f32 %v2154_v55 }
 0xb2a   :  { %v2156_v56 = vpop.eup %2155 }
 0xb2b   :  { %2161 = vrcp.f32 %v2156_v56 }
 0xb30   :  { %v2158_v57 = vpop.eup %2157 }
 0xb31   :  { %v1185_v60 = vmul.f32 %v2158_v57, %v2152_v3 }
 0xb33   :  { %v1191_v61 = vpack.c.bf16 %v1185_v60, %v1185_v60 }
 0xb34   :  { %v2160_v62 = vpop.eup %2159 }
 0xb35   :  { %2023 = vmatmul.mubr.msk.bf16.vlgmr.msra.gmra.mxu1 %vm393_vm4, %v1191_v61  ;;  %v1189_v0 = vmul.f32 %v2160_v62, %v2154_v55 }
 0xb36   :  { %2033 = vmatpush3.bf16.msra.mxu1 %v1344_v63  ;;  %2034 = vmatprep.mubr.msk.bf16.mxu1 %vm2190_vm0, %v2189_v1 }
 0xb37   :  { %2046 = vmatprep.subr.bf16.mxu1 %v2189_v1  ;;  %v1193_v8 = vpack.c.bf16 %v1189_v0, %v1189_v0 }
 0xb38   :  { %v2162_v2 = vpop.eup %2161 }
 0xb39   :  { %v1187_v4 = vmul.f32 %v2162_v2, %v2156_v56  ;;  %v1480_v56 = vrot.slane %v2429_v5, %v2383_v7 }
 0xb3b   :  { %v1192_v6 = vpack.c.bf16 %v1187_v4, %v1187_v4  ;;  %v1491_v57 = vcombine.high %v1480_v56, %v1480_v56  ;;  %v1487_v59 = vrot.slane %v1480_v56, %v2383_v7 }
 0xb3d   :  { %2029 = vmatmul.mubr.msk.bf16.vlgmr.msra.gmra.mxu0 %vm393_vm4, %v1192_v6  ;;  %2035 = vmatmul.mubr.msk.bf16.vlgmr.msra.gmra.mxu1 %vm393_vm4, %v1193_v8  ;;  %v1498_v60 = vrot.slane %v1491_v57, %v2383_v7  ;;  %v1488_v61 = vcombine.high %v1487_v59, %v1487_v59  ;;  %v2123_v8 = vld [vmem:[%s2577_s4 + $0x48] sm:$0xff]  }
 0xb3e   :  { %2042 = vmatprep.mubr.msk.bf16.mxu0 %vm2190_vm0, %v2189_v1  ;;  %2050 = vmatprep.mubr.msk.bf16.mxu1 %vm2190_vm0, %v2189_v1 }
 0xb3f   :  { %2039 = vmatpush3.bf16.msra.mxu0 %v2113_v12  ;;  %2047 = vmatpush3.bf16.msra.mxu1 %v2115_v47  ;;  %v1499_v0 = vcombine.high %v1498_v60, %v1498_v60 }
 0xb40   :  { %2040 = vmatprep.subr.bf16.mxu0 %v2189_v1  ;;  %2048 = vmatprep.subr.bf16.mxu1 %v2189_v1 }
 0xb43   :  { %2041 = vmatpush3.bf16.msra.mxu0 %v2114_v13 }
 0xb44   :  { %2054 = vmatprep.subr.bf16.mxu0 %v2189_v1 }
 0xb88   :  { %v1236_v27 = vpop.f32.mrf.mxu0 }
 0xb8a   :  { %v2018_v9 = vpop.f32.mrf.mxu0 }
 0xb8b   :  { %v1515_v9 = vrot.slane %v2429_v5, 4 }
 0xb8c   :  { %v1239_v10 = vpop.f32.mrf.mxu0 }
 0xb8e   :  { %v2019_v11 = vpop.f32.mrf.mxu0 }
 0xbf5   :  { %v1284_v14 = vpop.f32.mrf.mxu1 }
 0xbf6   :  { %1387 = vrot.lane.b32.xlu1 %v1284_v14, %s2197_s21 }
 0xbf7   :  { %v2024_v15 = vpop.f32.mrf.mxu1 }
 0xbf9   :  { %v1287_v16 = vpop.f32.mrf.mxu1 }
 0xbfb   :  { %v2025_v17 = vpop.f32.mrf.mxu1 }
 0xbfc   :  { %v1610_v17 = vrot.slane %v2429_v5, 5 }
 0xbfd   :  { %v1332_v18 = vpop.f32.mrf.mxu0  ;;  %v1380_v19 = vpop.f32.mrf.mxu1 }
 0xbfe   :  { %1391 = vrot.lane.b32.xlu0 %v1332_v18, %s2198_s22  ;;  %1395 = vrot.lane.b32.xlu1 %v1380_v19, %s2199_s23 }
 0xbff   :  { %v2030_v20 = vpop.f32.mrf.mxu0  ;;  %v2036_v21 = vpop.f32.mrf.mxu1 }
 0xc01   :  { %v1335_v22 = vpop.f32.mrf.mxu0  ;;  %v1383_v23 = vpop.f32.mrf.mxu1 }
 0xc03   :  { %v2031_v24 = vpop.f32.mrf.mxu0  ;;  %v2037_v25 = vpop.f32.mrf.mxu1 }
 0xc68   :  { %v1388_v26 = vpop.permute.xlu1 %1387 }
 0xc69   :  { %v1398_v28 = vsel %vm169_vm2, %v1236_v27, %v1388_v26  ;;  %v2124_v27 = vld [vmem:[%s2577_s4 + $0x40] sm:$0xff]  }
 0xc70   :  { %v1392_v29 = vpop.permute.xlu0 %1391  ;;  %v1396_v30 = vpop.permute.xlu1 %1395 }
 0xc71   :  { %v1399_v31 = vsel %vm600_vm5, %v1398_v28, %v1392_v29 }
 0xc72   :  { %v1400_v32 = vsel %vm602_vm6, %v1399_v31, %v1396_v30  ;;  %v2125_v31 = vld [vmem:[%s2579_s6 + $0x8] sm:$0xff]  }
 0xc73   :  { %v1401_v33 = vpack.c.bf16 %v1400_v32, %v1400_v32  ;;  %v2126_v32 = vld [vmem:[%s2579_s6] sm:$0xff]  }
 0xc75   :  { %2043 = vmatmul.mubr.msk.bf16.vlgmr.msra.gmra.mxu0 %vm108_vm1, %v1401_v33 }
 0xc76   :  { %2070 = vmatprep.mubr.msk.bf16.mxu0 %vm2190_vm0, %v2189_v1  ;;  %2055 = vmatpush3.bf16.msra.mxu0 %v2117_v48 }
 0xc77   :  { %2056 = vmatprep.subr.bf16.mxu0 %v2189_v1 }
 0xc7a   :  { %2057 = vmatpush3.bf16.msra.mxu0 %v2118_v49 }
 0xc7b   :  { %2058 = vmatprep.subr.bf16.mxu0 %v2189_v1 }
 0xc7e   :  { %2059 = vmatpush3.bf16.msra.mxu0 %v2119_v50 }
 0xc7f   :  { %2060 = vmatprep.subr.bf16.mxu0 %v2189_v1 }
 0xc82   :  { %2061 = vmatpush3.bf16.msra.mxu0 %v2120_v51 }
 0xc83   :  { %2062 = vmatprep.subr.bf16.mxu0 %v2189_v1 }
 0xc86   :  { %2063 = vmatpush3.bf16.msra.mxu0 %v2121_v52 }
 0xc87   :  { %2064 = vmatprep.subr.bf16.mxu0 %v2189_v1 }
 0xc8a   :  { %2065 = vmatpush3.bf16.msra.mxu0 %v2122_v53 }
 0xc8b   :  { %2066 = vmatprep.subr.bf16.mxu0 %v2189_v1 }
 0xc8e   :  { %2067 = vmatpush3.bf16.msra.mxu0 %v2123_v8 }
 0xc8f   :  { %2068 = vmatprep.subr.bf16.mxu0 %v2189_v1 }
 0xc92   :  { %2069 = vmatpush3.bf16.msra.mxu0 %v2124_v27 }
 0xd35   :  { %v1454_v35 = vpop.f32.mrf.mxu0 }
 0xd36   :  { %v1455_v36 = vadd.f32 %v1454_v35, %v1415_v34  ;;  %v1666_v35 = vcombine.high %v2429_v5, %v2429_v5  ;;  %v94_v5 = vld [vmem:[%s2580_s7] sm:$0x1] }
 0xd37   :  { %v2044_v37 = vpop.f32.mrf.mxu0 }
 0xd38   :  { %v1460_v38 = vadd.f32 %v1455_v36, %v2419_v58  ;;  %v2116_v58 = vld [vmem:[%s2576_s3 + $0x10] sm:$0xff]   ;;  %v1673_v37 = vrot.slane %v1666_v35, %v2383_v7 }
 0xd39   :  { %v1457_v39 = vpop.f32.mrf.mxu0  ;;  %2049 = vmatpush3.bf16.msra.mxu1 %v2116_v58 }
 0xd3a   :  { %v1461_v40 = vsel %vm664_vm7, %v1460_v38, 0.0  ;;  %2074 = vmatprep.subr.bf16.mxu1 %v2189_v1  ;;  %v1680_v39 = vrot.slane %v1673_v37, %v2383_v7 }
 0xd3b   :  { %1462 = vadd.xlane.f32.xlu0 %v1461_v40  ;;  %v2045_v41 = vpop.f32.mrf.mxu0 }
 0xd3c   :  { %v1681_v41 = vcombine.high %v1680_v39, %v1680_v39 }
 0xdc4   :  { %v1463_v42 = vpop.xlane.xlu0 %1462 }
 0xdc5   :  { %v1464_v43 = vmul.f32 0.03125, %v1463_v42 }
 0xdc7   :  { %v1465_v44 = vsub.f32 %v1460_v38, %v1464_v43  ;;  %v1684_v38 = vcombine.high %v1673_v37, %v1673_v37 }
 0xdc9   :  { %v1466_v45 = vmul.f32 %v1465_v44, %v1465_v44  ;;  %v1691_v40 = vrot.slane %v1684_v38, %v2383_v7 }
 0xdcb   :  { %v1467_v46 = vsel %vm664_vm7, %v1466_v45, 0.0 }
 0xdcc   :  { %1468 = vadd.xlane.f32.xlu1 %v1467_v46 }
 0xe55   :  { %v1469_v54 = vpop.xlane.xlu1 %1468 }
 0xe56   :  { %v1470_v3 = vmul.f32 0.03125, %v1469_v54 }
 0xe58   :  { %v1471_v55 = vadd.f32 1e-05, %v1470_v3 }
 0xe5a   :  { %2163 = vrsqrt.f32 %v1471_v55 }
 0xe67   :  { %v2164_v62 = vpop.eup %2163 }
 0xe68   :  { %v1473_v63 = vmul.f32 %v2164_v62, %v1465_v44  ;;  %v1692_v44 = vcombine.high %v1691_v40, %v1691_v40 }
 0xe6a   :  { %v1490_v2 = vmul.f32 %v1488_v61, %v1473_v63 }
 0xe6c   :  { %v1501_v4 = vadd.f32 %v1499_v0, %v1490_v2 }
 0xe6e   :  { %v1502_v6 = vpack.c.bf16 %v1501_v4, %v1501_v4 }
 0xe70   :  { %2051 = vmatmul.mubr.msk.bf16.vlgmr.msra.gmra.mxu1 %vm108_vm1, %v1502_v6 }
 0xe71   :  { %2078 = vmatprep.mubr.msk.bf16.mxu1 %vm2190_vm0, %v2189_v1  ;;  %2075 = vmatpush3.bf16.msra.mxu1 %v2125_v31 }
 0xe72   :  { %2076 = vmatprep.subr.bf16.mxu1 %v2189_v1 }
 0xe75   :  { %2077 = vmatpush3.bf16.msra.mxu1 %v2126_v32 }
 0xf30   :  { %v1554_v10 = vpop.f32.mrf.mxu1 }
 0xf31   :  { %v1555_v11 = vadd.f32 %v1554_v10, %v1515_v9 }
 0xf32   :  { %v2052_v12 = vpop.f32.mrf.mxu1 }
 0xf33   :  { %v1560_v13 = vmax.f32 %v1555_v11, 0.0 }
 0xf34   :  { %v1557_v14 = vpop.f32.mrf.mxu1 }
 0xf35   :  { %v1561_v15 = vpack.c.bf16 %v1560_v13, %v1560_v13 }
 0xf36   :  { %v2053_v16 = vpop.f32.mrf.mxu1 }
 0xf37   :  { %2071 = vmatmul.mubr.bf16.vlgmr.msra.gmra.mxu0 %v1561_v15 }
 0xff7   :  { %v1646_v18 = vpop.f32.mrf.mxu0 }
 0xff8   :  { %v1647_v19 = vadd.f32 %v1646_v18, %v1610_v17 }
 0xff9   :  { %v2072_v20 = vpop.f32.mrf.mxu0 }
 0xffa   :  { %v1652_v21 = vadd.f32 %v1647_v19, %v1501_v4 }
 0xffb   :  { %v1649_v22 = vpop.f32.mrf.mxu0 }
 0xffc   :  { %v1653_v23 = vsel %vm664_vm7, %v1652_v21, 0.0 }
 0xffd   :  { %1654 = vadd.xlane.f32.xlu0 %v1653_v23  ;;  %v2073_v24 = vpop.f32.mrf.mxu0 }
0x1086   :  { %v1655_v25 = vpop.xlane.xlu0 %1654 }
0x1087   :  { %v1656_v26 = vmul.f32 0.03125, %v1655_v25 }
0x1089   :  { %v1657_v28 = vsub.f32 %v1652_v21, %v1656_v26 }
0x108b   :  { %v1658_v29 = vmul.f32 %v1657_v28, %v1657_v28 }
0x108d   :  { %v1659_v30 = vsel %vm664_vm7, %v1658_v29, 0.0 }
0x108e   :  { %1660 = vadd.xlane.f32.xlu0 %v1659_v30 }
0x1117   :  { %v1661_v33 = vpop.xlane.xlu0 %1660 }
0x1118   :  { %v1662_v34 = vmul.f32 0.03125, %v1661_v33 }
0x111a   :  { %v1663_v36 = vadd.f32 1e-05, %v1662_v34 }
0x111c   :  { %2165 = vrsqrt.f32 %v1663_v36 }
0x1129   :  { %v2166_v42 = vpop.eup %2165 }
0x112a   :  { %v1665_v43 = vmul.f32 %v2166_v42, %v1657_v28 }
0x112c   :  { %v1683_v1 = vmul.f32 %v1681_v41, %v1665_v43 }
0x112e   :  { %v1694_v45 = vadd.f32 %v1692_v44, %v1683_v1 }
0x1130   :  { %v1695_v46 = vpack.c.bf16 %v1694_v45, %v1694_v45 }
0x1132   :  { %2079 = vmatmul.mubr.msk.bf16.vlgmr.msra.gmra.mxu1 %vm108_vm1, %v1695_v46 }
0x11f2   :  { %v1745_v47 = vpop.f32.mrf.mxu1 }
0x11f3   :  { %v1746_v58 = vadd.f32 %v1745_v47, %v94_v5 }
0x11f4   :  { %v2080_v48 = vpop.f32.mrf.mxu1 }
0x11f5   :  { %1751 = vst [vmem:[#allocation2] sm:$0x1] %v1746_v58 }
0x11f6   :  { %v1748_v7 = vpop.f32.mrf.mxu1 }
0x11f7   :  { %2178 = shalt.err (!%p2175_p4)
}
0x11f8   :  { %1761 = dma.vmem_to_hbm [thread:$0]  %s1759_s13, 16, %s2581_s8, [#allocation3]   ;;  %v2081_v49 = vpop.f32.mrf.mxu1 }
0x11f9   :  { %2187 = dma.done.wait [#allocation3], 16  }
0x11fa   :  { %2188 = vsyncadd [#allocation3], 4294967280 }
0x11fb   :  { %1765 = vsyncpa [#allocation3], 1 }

</bundles_post_ra>
